<compile_context>
chip_gen: v7x
topology: tpu7x:2x2x1
jax: 0.10.0
libtpu: 0.0.40
codegen_flags: <defaults>
</compile_context>

<pallas_src>
import jax
import jax.numpy as jnp
import numpy as np
from jax.experimental import pallas as pl
from jax.experimental.pallas import tpu as pltpu


# ---------------------------------------------------------------------------
# Fused Pallas kernel (built per (num_layers, T, B, H) configuration)
# ---------------------------------------------------------------------------
def _make_fused_lstm_kernel(num_layers, T, B, H):
    def kernel(*refs):
        # refs: x, (w_ih, w_hh, bias) * num_layers, fc_w, fc_b, y
        x_ref = refs[0]
        layer_refs = [refs[1 + 3 * l: 1 + 3 * (l + 1)] for l in range(num_layers)]
        fcw_ref = refs[1 + 3 * num_layers]          # (H, 1)
        fcb_ref = refs[2 + 3 * num_layers]          # (1, 1)
        y_ref = refs[3 + 3 * num_layers]            # (T*B, 1)

        seq = x_ref[...].astype(jnp.float32)        # (T*B, D_in), time-major rows

        for l in range(num_layers):
            wih_ref, whh_ref, b_ref = layer_refs[l]
            whh = whh_ref[...]                      # (H, 4H)
            # Hoisted input projection + loop-invariant bias: one larger matmul
            # instead of T tiny ones inside the recurrence.
            xp = jnp.dot(seq, wih_ref[...],
                         preferred_element_type=jnp.float32) + b_ref[...]   # (T*B, 4H)

            h = jnp.zeros((B, H), jnp.float32)
            c = jnp.zeros((B, H), jnp.float32)
            outs = []
            for t in range(T):                      # static unroll (T is small)
                gates = xp[t * B:(t + 1) * B, :] + jnp.dot(
                    h, whh, preferred_element_type=jnp.float32)             # (B, 4H)
                i = jax.nn.sigmoid(gates[:, 0 * H:1 * H])
                f = jax.nn.sigmoid(gates[:, 1 * H:2 * H])
                g = jnp.tanh(gates[:, 2 * H:3 * H])
                o = jax.nn.sigmoid(gates[:, 3 * H:4 * H])
                c = f * c + i * g
                h = o * jnp.tanh(c)
                outs.append(h)
            # VMEM/vreg-resident inter-layer activation (no HBM round trip).
            seq = jnp.concatenate(outs, axis=0)     # (T*B, H)

        # Fused FC head: one MXU dot + a single writeback.
        y = jnp.dot(seq, fcw_ref[...],
                    preferred_element_type=jnp.float32) + fcb_ref[...]      # (T*B, 1)
        y_ref[...] = y.astype(y_ref.dtype)

    return kernel


# ---------------------------------------------------------------------------
# Wrapper (public API matches the PyTorch module)
# ---------------------------------------------------------------------------
def lstm_model_forward(x, params):
    """x: (B, T, input_size) batch_first, like the PyTorch module. Returns (B, T)."""
    B, T, D = x.shape
    H = params["lstm"][0]["w_hh"].shape[0]
    num_layers = len(params["lstm"])

    # Flat time-major rows for the kernel (layout plumbing done by XLA, not in-kernel).
    x_flat = jnp.transpose(x, (1, 0, 2)).reshape(T * B, D).astype(jnp.float32)

    args = [x_flat]
    for layer in params["lstm"]:
        args += [layer["w_ih"], layer["w_hh"], layer["bias"]]
    args += [params["fc_w"].reshape(H, 1), params["fc_b"].reshape(1, 1)]

    y_flat = pl.pallas_call(
        _make_fused_lstm_kernel(num_layers, T, B, H),
        out_shape=jax.ShapeDtypeStruct((T * B, 1), jnp.float32),
    )(*args)

    return jnp.transpose(y_flat.reshape(T, B), (1, 0))   # (B, T)


# ---------------------------------------------------------------------------
# Deterministic parameter init (mimics PyTorch's U(-1/sqrt(H), 1/sqrt(H)))
# NOTE: weights stored transposed (D, 4H) relative to PyTorch's (4H, D); loading a
# real torch checkpoint would require a transpose.
# ---------------------------------------------------------------------------
def init_params(key, input_size, hidden_size, num_layers):
    k = 1.0 / np.sqrt(hidden_size)
    layers = []
    d_in = input_size
    for _ in range(num_layers):
        key, k1, k2, k3, k4 = jax.random.split(key, 5)
        w_ih = jax.random.uniform(k1, (d_in, 4 * hidden_size), jnp.float32, -k, k)
        w_hh = jax.random.uniform(k2, (hidden_size, 4 * hidden_size), jnp.float32, -k, k)
        b_ih = jax.random.uniform(k3, (4 * hidden_size,), jnp.float32, -k, k)
        b_hh = jax.random.uniform(k4, (4 * hidden_size,), jnp.float32, -k, k)
        layers.append({
            "w_ih": w_ih,
            "w_hh": w_hh,
            "bias": (b_ih + b_hh).reshape(1, 4 * hidden_size),
        })
        d_in = hidden_size
    key, k5, k6 = jax.random.split(key, 3)
    fc_w = jax.random.uniform(k5, (hidden_size,), jnp.float32, -k, k)
    fc_b = jax.random.uniform(k6, (1,), jnp.float32, -k, k)
    return {"lstm": layers, "fc_w": fc_w, "fc_b": fc_b}


# ---------------------------------------------------------------------------
# Pure-JAX reference (same math as torch.nn.LSTM + Linear)
# ---------------------------------------------------------------------------
def ref_forward(x, params):
    B, T, _ = x.shape
    h_seq = x.astype(jnp.float32)
    for layer in params["lstm"]:
        H = layer["w_hh"].shape[0]
        h = jnp.zeros((B, H), jnp.float32)
        c = jnp.zeros((B, H), jnp.float32)
        outs = []
        for t in range(T):
            gates = h_seq[:, t] @ layer["w_ih"] + h @ layer["w_hh"] + layer["bias"]
            i = jax.nn.sigmoid(gates[:, 0 * H:1 * H])
            f = jax.nn.sigmoid(gates[:, 1 * H:2 * H])
            g = jnp.tanh(gates[:, 2 * H:3 * H])
            o = jax.nn.sigmoid(gates[:, 3 * H:4 * H])
            c = f * c + i * g
            h = o * jnp.tanh(c)
            outs.append(h)
        h_seq = jnp.stack(outs, axis=1)
    y = h_seq @ params["fc_w"].reshape(-1, 1) + params["fc_b"]
    return y[..., 0]


if __name__ == "__main__":
    B, T = 2, 8
    input_size, hidden_size, num_layers = 8, 32, 2

    key = jax.random.PRNGKey(0)
    key, kx, kp = jax.random.split(key, 3)
    x = jax.random.normal(kx, (B, T, input_size), jnp.float32)
    params = init_params(kp, input_size, hidden_size, num_layers)

    y = jax.block_until_ready(lstm_model_forward(x, params))   # (B, T)
    y_ref = jax.block_until_ready(ref_forward(x, params))

    assert y.shape == (B, T), y.shape
    np.testing.assert_allclose(np.asarray(y), np.asarray(y_ref), atol=1e-4, rtol=1e-4)
    print("KERNEL_OK")
</pallas_src>

<mosaic_0001>
module attributes {stable_mosaic.version = 11 : i64} {
  func.func @kernel(%arg0: memref<16x8xf32, #tpu.memory_space<vmem>>, %arg1: memref<8x128xf32, #tpu.memory_space<vmem>>, %arg2: memref<32x128xf32, #tpu.memory_space<vmem>>, %arg3: memref<1x128xf32, #tpu.memory_space<vmem>>, %arg4: memref<32x128xf32, #tpu.memory_space<vmem>>, %arg5: memref<32x128xf32, #tpu.memory_space<vmem>>, %arg6: memref<1x128xf32, #tpu.memory_space<vmem>>, %arg7: memref<32x1xf32, #tpu.memory_space<vmem>>, %arg8: memref<1x1xf32, #tpu.memory_space<vmem>>, %arg9: memref<16x1xf32, #tpu.memory_space<vmem>>) attributes {dimension_semantics = [], scalar_prefetch = 0 : i64, scratch_operands = 0 : i64, tpu.core_type = #tpu.core_type<tc>} {
    %c0 = arith.constant 0 : index
    %c0_0 = arith.constant 0 : index
    %0 = vector.load %arg0[%c0, %c0_0] : memref<16x8xf32, #tpu.memory_space<vmem>>, vector<16x8xf32>
    %c0_1 = arith.constant 0 : index
    %c0_2 = arith.constant 0 : index
    %1 = vector.load %arg2[%c0_1, %c0_2] : memref<32x128xf32, #tpu.memory_space<vmem>>, vector<32x128xf32>
    %c0_3 = arith.constant 0 : index
    %c0_4 = arith.constant 0 : index
    %2 = vector.load %arg1[%c0_3, %c0_4] : memref<8x128xf32, #tpu.memory_space<vmem>>, vector<8x128xf32>
    %cst = arith.constant dense<0.000000e+00> : vector<16x128xf32>
    %3 = tpu.matmul %0, %2, %cst {dimension_numbers = #tpu.dot_dimension_numbers<[1], [0], [0], [1], [0, 0, 1, 1], [], []>} : vector<16x8xf32>, vector<8x128xf32>, vector<16x128xf32> -> vector<16x128xf32>
    %c0_5 = arith.constant 0 : index
    %c0_6 = arith.constant 0 : index
    %4 = vector.load %arg3[%c0_5, %c0_6] : memref<1x128xf32, #tpu.memory_space<vmem>>, vector<1x128xf32>
    %5 = vector.broadcast %4 : vector<1x128xf32> to vector<16x128xf32>
    %6 = arith.addf %3, %5 : vector<16x128xf32>
    %cst_7 = arith.constant 0.000000e+00 : f32
    %7 = vector.broadcast %cst_7 : f32 to vector<2x32xf32>
    %cst_8 = arith.constant 0.000000e+00 : f32
    %8 = vector.broadcast %cst_8 : f32 to vector<2x32xf32>
    %9 = vector.extract_strided_slice %6 {offsets = [0, 0], sizes = [2, 128], strides = [1, 1]} : vector<16x128xf32> to vector<2x128xf32>
    %cst_9 = arith.constant dense<0.000000e+00> : vector<2x128xf32>
    %10 = tpu.matmul %7, %1, %cst_9 {dimension_numbers = #tpu.dot_dimension_numbers<[1], [0], [0], [1], [0, 0, 1, 1], [], []>} : vector<2x32xf32>, vector<32x128xf32>, vector<2x128xf32> -> vector<2x128xf32>
    %11 = arith.addf %9, %10 : vector<2x128xf32>
    %12 = vector.extract_strided_slice %11 {offsets = [0, 0], sizes = [2, 32], strides = [1, 1]} : vector<2x128xf32> to vector<2x32xf32>
    %13 = arith.negf %12 : vector<2x32xf32>
    %14 = math.exp %13 : vector<2x32xf32>
    %cst_10 = arith.constant 1.000000e+00 : f32
    %15 = vector.broadcast %cst_10 : f32 to vector<2x32xf32>
    %16 = arith.addf %15, %14 : vector<2x32xf32>
    %17 = arith.divf %15, %16 : vector<2x32xf32>
    %18 = vector.extract_strided_slice %11 {offsets = [0, 32], sizes = [2, 32], strides = [1, 1]} : vector<2x128xf32> to vector<2x32xf32>
    %19 = arith.negf %18 : vector<2x32xf32>
    %20 = math.exp %19 : vector<2x32xf32>
    %cst_11 = arith.constant 1.000000e+00 : f32
    %21 = vector.broadcast %cst_11 : f32 to vector<2x32xf32>
    %22 = arith.addf %21, %20 : vector<2x32xf32>
    %23 = arith.divf %21, %22 : vector<2x32xf32>
    %24 = vector.extract_strided_slice %11 {offsets = [0, 64], sizes = [2, 32], strides = [1, 1]} : vector<2x128xf32> to vector<2x32xf32>
    %25 = math.tanh %24 : vector<2x32xf32>
    %26 = vector.extract_strided_slice %11 {offsets = [0, 96], sizes = [2, 32], strides = [1, 1]} : vector<2x128xf32> to vector<2x32xf32>
    %27 = arith.negf %26 : vector<2x32xf32>
    %28 = math.exp %27 : vector<2x32xf32>
    %cst_12 = arith.constant 1.000000e+00 : f32
    %29 = vector.broadcast %cst_12 : f32 to vector<2x32xf32>
    %30 = arith.addf %29, %28 : vector<2x32xf32>
    %31 = arith.divf %29, %30 : vector<2x32xf32>
    %32 = arith.mulf %23, %8 : vector<2x32xf32>
    %33 = arith.mulf %17, %25 : vector<2x32xf32>
    %34 = arith.addf %32, %33 : vector<2x32xf32>
    %35 = math.tanh %34 : vector<2x32xf32>
    %36 = arith.mulf %31, %35 : vector<2x32xf32>
    %37 = vector.extract_strided_slice %6 {offsets = [2, 0], sizes = [2, 128], strides = [1, 1]} : vector<16x128xf32> to vector<2x128xf32>
    %cst_13 = arith.constant dense<0.000000e+00> : vector<2x128xf32>
    %38 = tpu.matmul %36, %1, %cst_13 {dimension_numbers = #tpu.dot_dimension_numbers<[1], [0], [0], [1], [0, 0, 1, 1], [], []>} : vector<2x32xf32>, vector<32x128xf32>, vector<2x128xf32> -> vector<2x128xf32>
    %39 = arith.addf %37, %38 : vector<2x128xf32>
    %40 = vector.extract_strided_slice %39 {offsets = [0, 0], sizes = [2, 32], strides = [1, 1]} : vector<2x128xf32> to vector<2x32xf32>
    %41 = arith.negf %40 : vector<2x32xf32>
    %42 = math.exp %41 : vector<2x32xf32>
    %cst_14 = arith.constant 1.000000e+00 : f32
    %43 = vector.broadcast %cst_14 : f32 to vector<2x32xf32>
    %44 = arith.addf %43, %42 : vector<2x32xf32>
    %45 = arith.divf %43, %44 : vector<2x32xf32>
    %46 = vector.extract_strided_slice %39 {offsets = [0, 32], sizes = [2, 32], strides = [1, 1]} : vector<2x128xf32> to vector<2x32xf32>
    %47 = arith.negf %46 : vector<2x32xf32>
    %48 = math.exp %47 : vector<2x32xf32>
    %cst_15 = arith.constant 1.000000e+00 : f32
    %49 = vector.broadcast %cst_15 : f32 to vector<2x32xf32>
    %50 = arith.addf %49, %48 : vector<2x32xf32>
    %51 = arith.divf %49, %50 : vector<2x32xf32>
    %52 = vector.extract_strided_slice %39 {offsets = [0, 64], sizes = [2, 32], strides = [1, 1]} : vector<2x128xf32> to vector<2x32xf32>
    %53 = math.tanh %52 : vector<2x32xf32>
    %54 = vector.extract_strided_slice %39 {offsets = [0, 96], sizes = [2, 32], strides = [1, 1]} : vector<2x128xf32> to vector<2x32xf32>
    %55 = arith.negf %54 : vector<2x32xf32>
    %56 = math.exp %55 : vector<2x32xf32>
    %cst_16 = arith.constant 1.000000e+00 : f32
    %57 = vector.broadcast %cst_16 : f32 to vector<2x32xf32>
    %58 = arith.addf %57, %56 : vector<2x32xf32>
    %59 = arith.divf %57, %58 : vector<2x32xf32>
    %60 = arith.mulf %51, %34 : vector<2x32xf32>
    %61 = arith.mulf %45, %53 : vector<2x32xf32>
    %62 = arith.addf %60, %61 : vector<2x32xf32>
    %63 = math.tanh %62 : vector<2x32xf32>
    %64 = arith.mulf %59, %63 : vector<2x32xf32>
    %65 = vector.extract_strided_slice %6 {offsets = [4, 0], sizes = [2, 128], strides = [1, 1]} : vector<16x128xf32> to vector<2x128xf32>
    %cst_17 = arith.constant dense<0.000000e+00> : vector<2x128xf32>
    %66 = tpu.matmul %64, %1, %cst_17 {dimension_numbers = #tpu.dot_dimension_numbers<[1], [0], [0], [1], [0, 0, 1, 1], [], []>} : vector<2x32xf32>, vector<32x128xf32>, vector<2x128xf32> -> vector<2x128xf32>
    %67 = arith.addf %65, %66 : vector<2x128xf32>
    %68 = vector.extract_strided_slice %67 {offsets = [0, 0], sizes = [2, 32], strides = [1, 1]} : vector<2x128xf32> to vector<2x32xf32>
    %69 = arith.negf %68 : vector<2x32xf32>
    %70 = math.exp %69 : vector<2x32xf32>
    %cst_18 = arith.constant 1.000000e+00 : f32
    %71 = vector.broadcast %cst_18 : f32 to vector<2x32xf32>
    %72 = arith.addf %71, %70 : vector<2x32xf32>
    %73 = arith.divf %71, %72 : vector<2x32xf32>
    %74 = vector.extract_strided_slice %67 {offsets = [0, 32], sizes = [2, 32], strides = [1, 1]} : vector<2x128xf32> to vector<2x32xf32>
    %75 = arith.negf %74 : vector<2x32xf32>
    %76 = math.exp %75 : vector<2x32xf32>
    %cst_19 = arith.constant 1.000000e+00 : f32
    %77 = vector.broadcast %cst_19 : f32 to vector<2x32xf32>
    %78 = arith.addf %77, %76 : vector<2x32xf32>
    %79 = arith.divf %77, %78 : vector<2x32xf32>
    %80 = vector.extract_strided_slice %67 {offsets = [0, 64], sizes = [2, 32], strides = [1, 1]} : vector<2x128xf32> to vector<2x32xf32>
    %81 = math.tanh %80 : vector<2x32xf32>
    %82 = vector.extract_strided_slice %67 {offsets = [0, 96], sizes = [2, 32], strides = [1, 1]} : vector<2x128xf32> to vector<2x32xf32>
    %83 = arith.negf %82 : vector<2x32xf32>
    %84 = math.exp %83 : vector<2x32xf32>
    %cst_20 = arith.constant 1.000000e+00 : f32
    %85 = vector.broadcast %cst_20 : f32 to vector<2x32xf32>
    %86 = arith.addf %85, %84 : vector<2x32xf32>
    %87 = arith.divf %85, %86 : vector<2x32xf32>
    %88 = arith.mulf %79, %62 : vector<2x32xf32>
    %89 = arith.mulf %73, %81 : vector<2x32xf32>
    %90 = arith.addf %88, %89 : vector<2x32xf32>
    %91 = math.tanh %90 : vector<2x32xf32>
    %92 = arith.mulf %87, %91 : vector<2x32xf32>
    %93 = vector.extract_strided_slice %6 {offsets = [6, 0], sizes = [2, 128], strides = [1, 1]} : vector<16x128xf32> to vector<2x128xf32>
    %cst_21 = arith.constant dense<0.000000e+00> : vector<2x128xf32>
    %94 = tpu.matmul %92, %1, %cst_21 {dimension_numbers = #tpu.dot_dimension_numbers<[1], [0], [0], [1], [0, 0, 1, 1], [], []>} : vector<2x32xf32>, vector<32x128xf32>, vector<2x128xf32> -> vector<2x128xf32>
    %95 = arith.addf %93, %94 : vector<2x128xf32>
    %96 = vector.extract_strided_slice %95 {offsets = [0, 0], sizes = [2, 32], strides = [1, 1]} : vector<2x128xf32> to vector<2x32xf32>
    %97 = arith.negf %96 : vector<2x32xf32>
    %98 = math.exp %97 : vector<2x32xf32>
    %cst_22 = arith.constant 1.000000e+00 : f32
    %99 = vector.broadcast %cst_22 : f32 to vector<2x32xf32>
    %100 = arith.addf %99, %98 : vector<2x32xf32>
    %101 = arith.divf %99, %100 : vector<2x32xf32>
    %102 = vector.extract_strided_slice %95 {offsets = [0, 32], sizes = [2, 32], strides = [1, 1]} : vector<2x128xf32> to vector<2x32xf32>
    %103 = arith.negf %102 : vector<2x32xf32>
    %104 = math.exp %103 : vector<2x32xf32>
    %cst_23 = arith.constant 1.000000e+00 : f32
    %105 = vector.broadcast %cst_23 : f32 to vector<2x32xf32>
    %106 = arith.addf %105, %104 : vector<2x32xf32>
    %107 = arith.divf %105, %106 : vector<2x32xf32>
    %108 = vector.extract_strided_slice %95 {offsets = [0, 64], sizes = [2, 32], strides = [1, 1]} : vector<2x128xf32> to vector<2x32xf32>
    %109 = math.tanh %108 : vector<2x32xf32>
    %110 = vector.extract_strided_slice %95 {offsets = [0, 96], sizes = [2, 32], strides = [1, 1]} : vector<2x128xf32> to vector<2x32xf32>
    %111 = arith.negf %110 : vector<2x32xf32>
    %112 = math.exp %111 : vector<2x32xf32>
    %cst_24 = arith.constant 1.000000e+00 : f32
    %113 = vector.broadcast %cst_24 : f32 to vector<2x32xf32>
    %114 = arith.addf %113, %112 : vector<2x32xf32>
    %115 = arith.divf %113, %114 : vector<2x32xf32>
    %116 = arith.mulf %107, %90 : vector<2x32xf32>
    %117 = arith.mulf %101, %109 : vector<2x32xf32>
    %118 = arith.addf %116, %117 : vector<2x32xf32>
    %119 = math.tanh %118 : vector<2x32xf32>
    %120 = arith.mulf %115, %119 : vector<2x32xf32>
    %121 = vector.extract_strided_slice %6 {offsets = [8, 0], sizes = [2, 128], strides = [1, 1]} : vector<16x128xf32> to vector<2x128xf32>
    %cst_25 = arith.constant dense<0.000000e+00> : vector<2x128xf32>
    %122 = tpu.matmul %120, %1, %cst_25 {dimension_numbers = #tpu.dot_dimension_numbers<[1], [0], [0], [1], [0, 0, 1, 1], [], []>} : vector<2x32xf32>, vector<32x128xf32>, vector<2x128xf32> -> vector<2x128xf32>
    %123 = arith.addf %121, %122 : vector<2x128xf32>
    %124 = vector.extract_strided_slice %123 {offsets = [0, 0], sizes = [2, 32], strides = [1, 1]} : vector<2x128xf32> to vector<2x32xf32>
    %125 = arith.negf %124 : vector<2x32xf32>
    %126 = math.exp %125 : vector<2x32xf32>
    %cst_26 = arith.constant 1.000000e+00 : f32
    %127 = vector.broadcast %cst_26 : f32 to vector<2x32xf32>
    %128 = arith.addf %127, %126 : vector<2x32xf32>
    %129 = arith.divf %127, %128 : vector<2x32xf32>
    %130 = vector.extract_strided_slice %123 {offsets = [0, 32], sizes = [2, 32], strides = [1, 1]} : vector<2x128xf32> to vector<2x32xf32>
    %131 = arith.negf %130 : vector<2x32xf32>
    %132 = math.exp %131 : vector<2x32xf32>
    %cst_27 = arith.constant 1.000000e+00 : f32
    %133 = vector.broadcast %cst_27 : f32 to vector<2x32xf32>
    %134 = arith.addf %133, %132 : vector<2x32xf32>
    %135 = arith.divf %133, %134 : vector<2x32xf32>
    %136 = vector.extract_strided_slice %123 {offsets = [0, 64], sizes = [2, 32], strides = [1, 1]} : vector<2x128xf32> to vector<2x32xf32>
    %137 = math.tanh %136 : vector<2x32xf32>
    %138 = vector.extract_strided_slice %123 {offsets = [0, 96], sizes = [2, 32], strides = [1, 1]} : vector<2x128xf32> to vector<2x32xf32>
    %139 = arith.negf %138 : vector<2x32xf32>
    %140 = math.exp %139 : vector<2x32xf32>
    %cst_28 = arith.constant 1.000000e+00 : f32
    %141 = vector.broadcast %cst_28 : f32 to vector<2x32xf32>
    %142 = arith.addf %141, %140 : vector<2x32xf32>
    %143 = arith.divf %141, %142 : vector<2x32xf32>
    %144 = arith.mulf %135, %118 : vector<2x32xf32>
    %145 = arith.mulf %129, %137 : vector<2x32xf32>
    %146 = arith.addf %144, %145 : vector<2x32xf32>
    %147 = math.tanh %146 : vector<2x32xf32>
    %148 = arith.mulf %143, %147 : vector<2x32xf32>
    %149 = vector.extract_strided_slice %6 {offsets = [10, 0], sizes = [2, 128], strides = [1, 1]} : vector<16x128xf32> to vector<2x128xf32>
    %cst_29 = arith.constant dense<0.000000e+00> : vector<2x128xf32>
    %150 = tpu.matmul %148, %1, %cst_29 {dimension_numbers = #tpu.dot_dimension_numbers<[1], [0], [0], [1], [0, 0, 1, 1], [], []>} : vector<2x32xf32>, vector<32x128xf32>, vector<2x128xf32> -> vector<2x128xf32>
    %151 = arith.addf %149, %150 : vector<2x128xf32>
    %152 = vector.extract_strided_slice %151 {offsets = [0, 0], sizes = [2, 32], strides = [1, 1]} : vector<2x128xf32> to vector<2x32xf32>
    %153 = arith.negf %152 : vector<2x32xf32>
    %154 = math.exp %153 : vector<2x32xf32>
    %cst_30 = arith.constant 1.000000e+00 : f32
    %155 = vector.broadcast %cst_30 : f32 to vector<2x32xf32>
    %156 = arith.addf %155, %154 : vector<2x32xf32>
    %157 = arith.divf %155, %156 : vector<2x32xf32>
    %158 = vector.extract_strided_slice %151 {offsets = [0, 32], sizes = [2, 32], strides = [1, 1]} : vector<2x128xf32> to vector<2x32xf32>
    %159 = arith.negf %158 : vector<2x32xf32>
    %160 = math.exp %159 : vector<2x32xf32>
    %cst_31 = arith.constant 1.000000e+00 : f32
    %161 = vector.broadcast %cst_31 : f32 to vector<2x32xf32>
    %162 = arith.addf %161, %160 : vector<2x32xf32>
    %163 = arith.divf %161, %162 : vector<2x32xf32>
    %164 = vector.extract_strided_slice %151 {offsets = [0, 64], sizes = [2, 32], strides = [1, 1]} : vector<2x128xf32> to vector<2x32xf32>
    %165 = math.tanh %164 : vector<2x32xf32>
    %166 = vector.extract_strided_slice %151 {offsets = [0, 96], sizes = [2, 32], strides = [1, 1]} : vector<2x128xf32> to vector<2x32xf32>
    %167 = arith.negf %166 : vector<2x32xf32>
    %168 = math.exp %167 : vector<2x32xf32>
    %cst_32 = arith.constant 1.000000e+00 : f32
    %169 = vector.broadcast %cst_32 : f32 to vector<2x32xf32>
    %170 = arith.addf %169, %168 : vector<2x32xf32>
    %171 = arith.divf %169, %170 : vector<2x32xf32>
    %172 = arith.mulf %163, %146 : vector<2x32xf32>
    %173 = arith.mulf %157, %165 : vector<2x32xf32>
    %174 = arith.addf %172, %173 : vector<2x32xf32>
    %175 = math.tanh %174 : vector<2x32xf32>
    %176 = arith.mulf %171, %175 : vector<2x32xf32>
    %177 = vector.extract_strided_slice %6 {offsets = [12, 0], sizes = [2, 128], strides = [1, 1]} : vector<16x128xf32> to vector<2x128xf32>
    %cst_33 = arith.constant dense<0.000000e+00> : vector<2x128xf32>
    %178 = tpu.matmul %176, %1, %cst_33 {dimension_numbers = #tpu.dot_dimension_numbers<[1], [0], [0], [1], [0, 0, 1, 1], [], []>} : vector<2x32xf32>, vector<32x128xf32>, vector<2x128xf32> -> vector<2x128xf32>
    %179 = arith.addf %177, %178 : vector<2x128xf32>
    %180 = vector.extract_strided_slice %179 {offsets = [0, 0], sizes = [2, 32], strides = [1, 1]} : vector<2x128xf32> to vector<2x32xf32>
    %181 = arith.negf %180 : vector<2x32xf32>
    %182 = math.exp %181 : vector<2x32xf32>
    %cst_34 = arith.constant 1.000000e+00 : f32
    %183 = vector.broadcast %cst_34 : f32 to vector<2x32xf32>
    %184 = arith.addf %183, %182 : vector<2x32xf32>
    %185 = arith.divf %183, %184 : vector<2x32xf32>
    %186 = vector.extract_strided_slice %179 {offsets = [0, 32], sizes = [2, 32], strides = [1, 1]} : vector<2x128xf32> to vector<2x32xf32>
    %187 = arith.negf %186 : vector<2x32xf32>
    %188 = math.exp %187 : vector<2x32xf32>
    %cst_35 = arith.constant 1.000000e+00 : f32
    %189 = vector.broadcast %cst_35 : f32 to vector<2x32xf32>
    %190 = arith.addf %189, %188 : vector<2x32xf32>
    %191 = arith.divf %189, %190 : vector<2x32xf32>
    %192 = vector.extract_strided_slice %179 {offsets = [0, 64], sizes = [2, 32], strides = [1, 1]} : vector<2x128xf32> to vector<2x32xf32>
    %193 = math.tanh %192 : vector<2x32xf32>
    %194 = vector.extract_strided_slice %179 {offsets = [0, 96], sizes = [2, 32], strides = [1, 1]} : vector<2x128xf32> to vector<2x32xf32>
    %195 = arith.negf %194 : vector<2x32xf32>
    %196 = math.exp %195 : vector<2x32xf32>
    %cst_36 = arith.constant 1.000000e+00 : f32
    %197 = vector.broadcast %cst_36 : f32 to vector<2x32xf32>
    %198 = arith.addf %197, %196 : vector<2x32xf32>
    %199 = arith.divf %197, %198 : vector<2x32xf32>
    %200 = arith.mulf %191, %174 : vector<2x32xf32>
    %201 = arith.mulf %185, %193 : vector<2x32xf32>
    %202 = arith.addf %200, %201 : vector<2x32xf32>
    %203 = math.tanh %202 : vector<2x32xf32>
    %204 = arith.mulf %199, %203 : vector<2x32xf32>
    %205 = vector.extract_strided_slice %6 {offsets = [14, 0], sizes = [2, 128], strides = [1, 1]} : vector<16x128xf32> to vector<2x128xf32>
    %cst_37 = arith.constant dense<0.000000e+00> : vector<2x128xf32>
    %206 = tpu.matmul %204, %1, %cst_37 {dimension_numbers = #tpu.dot_dimension_numbers<[1], [0], [0], [1], [0, 0, 1, 1], [], []>} : vector<2x32xf32>, vector<32x128xf32>, vector<2x128xf32> -> vector<2x128xf32>
    %207 = arith.addf %205, %206 : vector<2x128xf32>
    %208 = vector.extract_strided_slice %207 {offsets = [0, 0], sizes = [2, 32], strides = [1, 1]} : vector<2x128xf32> to vector<2x32xf32>
    %209 = arith.negf %208 : vector<2x32xf32>
    %210 = math.exp %209 : vector<2x32xf32>
    %cst_38 = arith.constant 1.000000e+00 : f32
    %211 = vector.broadcast %cst_38 : f32 to vector<2x32xf32>
    %212 = arith.addf %211, %210 : vector<2x32xf32>
    %213 = arith.divf %211, %212 : vector<2x32xf32>
    %214 = vector.extract_strided_slice %207 {offsets = [0, 32], sizes = [2, 32], strides = [1, 1]} : vector<2x128xf32> to vector<2x32xf32>
    %215 = arith.negf %214 : vector<2x32xf32>
    %216 = math.exp %215 : vector<2x32xf32>
    %cst_39 = arith.constant 1.000000e+00 : f32
    %217 = vector.broadcast %cst_39 : f32 to vector<2x32xf32>
    %218 = arith.addf %217, %216 : vector<2x32xf32>
    %219 = arith.divf %217, %218 : vector<2x32xf32>
    %220 = vector.extract_strided_slice %207 {offsets = [0, 64], sizes = [2, 32], strides = [1, 1]} : vector<2x128xf32> to vector<2x32xf32>
    %221 = math.tanh %220 : vector<2x32xf32>
    %222 = vector.extract_strided_slice %207 {offsets = [0, 96], sizes = [2, 32], strides = [1, 1]} : vector<2x128xf32> to vector<2x32xf32>
    %223 = arith.negf %222 : vector<2x32xf32>
    %224 = math.exp %223 : vector<2x32xf32>
    %cst_40 = arith.constant 1.000000e+00 : f32
    %225 = vector.broadcast %cst_40 : f32 to vector<2x32xf32>
    %226 = arith.addf %225, %224 : vector<2x32xf32>
    %227 = arith.divf %225, %226 : vector<2x32xf32>
    %228 = arith.mulf %219, %202 : vector<2x32xf32>
    %229 = arith.mulf %213, %221 : vector<2x32xf32>
    %230 = arith.addf %228, %229 : vector<2x32xf32>
    %231 = math.tanh %230 : vector<2x32xf32>
    %232 = arith.mulf %227, %231 : vector<2x32xf32>
    %233 = tpu.concatenate %36, %64, %92, %120, %148, %176, %204, %232 in 0 : vector<2x32xf32>, vector<2x32xf32>, vector<2x32xf32>, vector<2x32xf32>, vector<2x32xf32>, vector<2x32xf32>, vector<2x32xf32>, vector<2x32xf32> -> vector<16x32xf32>
    %c0_41 = arith.constant 0 : index
    %c0_42 = arith.constant 0 : index
    %234 = vector.load %arg5[%c0_41, %c0_42] : memref<32x128xf32, #tpu.memory_space<vmem>>, vector<32x128xf32>
    %c0_43 = arith.constant 0 : index
    %c0_44 = arith.constant 0 : index
    %235 = vector.load %arg4[%c0_43, %c0_44] : memref<32x128xf32, #tpu.memory_space<vmem>>, vector<32x128xf32>
    %cst_45 = arith.constant dense<0.000000e+00> : vector<16x128xf32>
    %236 = tpu.matmul %233, %235, %cst_45 {dimension_numbers = #tpu.dot_dimension_numbers<[1], [0], [0], [1], [0, 0, 1, 1], [], []>} : vector<16x32xf32>, vector<32x128xf32>, vector<16x128xf32> -> vector<16x128xf32>
    %c0_46 = arith.constant 0 : index
    %c0_47 = arith.constant 0 : index
    %237 = vector.load %arg6[%c0_46, %c0_47] : memref<1x128xf32, #tpu.memory_space<vmem>>, vector<1x128xf32>
    %238 = vector.broadcast %237 : vector<1x128xf32> to vector<16x128xf32>
    %239 = arith.addf %236, %238 : vector<16x128xf32>
    %cst_48 = arith.constant 0.000000e+00 : f32
    %240 = vector.broadcast %cst_48 : f32 to vector<2x32xf32>
    %cst_49 = arith.constant 0.000000e+00 : f32
    %241 = vector.broadcast %cst_49 : f32 to vector<2x32xf32>
    %242 = vector.extract_strided_slice %239 {offsets = [0, 0], sizes = [2, 128], strides = [1, 1]} : vector<16x128xf32> to vector<2x128xf32>
    %cst_50 = arith.constant dense<0.000000e+00> : vector<2x128xf32>
    %243 = tpu.matmul %240, %234, %cst_50 {dimension_numbers = #tpu.dot_dimension_numbers<[1], [0], [0], [1], [0, 0, 1, 1], [], []>} : vector<2x32xf32>, vector<32x128xf32>, vector<2x128xf32> -> vector<2x128xf32>
    %244 = arith.addf %242, %243 : vector<2x128xf32>
    %245 = vector.extract_strided_slice %244 {offsets = [0, 0], sizes = [2, 32], strides = [1, 1]} : vector<2x128xf32> to vector<2x32xf32>
    %246 = arith.negf %245 : vector<2x32xf32>
    %247 = math.exp %246 : vector<2x32xf32>
    %cst_51 = arith.constant 1.000000e+00 : f32
    %248 = vector.broadcast %cst_51 : f32 to vector<2x32xf32>
    %249 = arith.addf %248, %247 : vector<2x32xf32>
    %250 = arith.divf %248, %249 : vector<2x32xf32>
    %251 = vector.extract_strided_slice %244 {offsets = [0, 32], sizes = [2, 32], strides = [1, 1]} : vector<2x128xf32> to vector<2x32xf32>
    %252 = arith.negf %251 : vector<2x32xf32>
    %253 = math.exp %252 : vector<2x32xf32>
    %cst_52 = arith.constant 1.000000e+00 : f32
    %254 = vector.broadcast %cst_52 : f32 to vector<2x32xf32>
    %255 = arith.addf %254, %253 : vector<2x32xf32>
    %256 = arith.divf %254, %255 : vector<2x32xf32>
    %257 = vector.extract_strided_slice %244 {offsets = [0, 64], sizes = [2, 32], strides = [1, 1]} : vector<2x128xf32> to vector<2x32xf32>
    %258 = math.tanh %257 : vector<2x32xf32>
    %259 = vector.extract_strided_slice %244 {offsets = [0, 96], sizes = [2, 32], strides = [1, 1]} : vector<2x128xf32> to vector<2x32xf32>
    %260 = arith.negf %259 : vector<2x32xf32>
    %261 = math.exp %260 : vector<2x32xf32>
    %cst_53 = arith.constant 1.000000e+00 : f32
    %262 = vector.broadcast %cst_53 : f32 to vector<2x32xf32>
    %263 = arith.addf %262, %261 : vector<2x32xf32>
    %264 = arith.divf %262, %263 : vector<2x32xf32>
    %265 = arith.mulf %256, %241 : vector<2x32xf32>
    %266 = arith.mulf %250, %258 : vector<2x32xf32>
    %267 = arith.addf %265, %266 : vector<2x32xf32>
    %268 = math.tanh %267 : vector<2x32xf32>
    %269 = arith.mulf %264, %268 : vector<2x32xf32>
    %270 = vector.extract_strided_slice %239 {offsets = [2, 0], sizes = [2, 128], strides = [1, 1]} : vector<16x128xf32> to vector<2x128xf32>
    %cst_54 = arith.constant dense<0.000000e+00> : vector<2x128xf32>
    %271 = tpu.matmul %269, %234, %cst_54 {dimension_numbers = #tpu.dot_dimension_numbers<[1], [0], [0], [1], [0, 0, 1, 1], [], []>} : vector<2x32xf32>, vector<32x128xf32>, vector<2x128xf32> -> vector<2x128xf32>
    %272 = arith.addf %270, %271 : vector<2x128xf32>
    %273 = vector.extract_strided_slice %272 {offsets = [0, 0], sizes = [2, 32], strides = [1, 1]} : vector<2x128xf32> to vector<2x32xf32>
    %274 = arith.negf %273 : vector<2x32xf32>
    %275 = math.exp %274 : vector<2x32xf32>
    %cst_55 = arith.constant 1.000000e+00 : f32
    %276 = vector.broadcast %cst_55 : f32 to vector<2x32xf32>
    %277 = arith.addf %276, %275 : vector<2x32xf32>
    %278 = arith.divf %276, %277 : vector<2x32xf32>
    %279 = vector.extract_strided_slice %272 {offsets = [0, 32], sizes = [2, 32], strides = [1, 1]} : vector<2x128xf32> to vector<2x32xf32>
    %280 = arith.negf %279 : vector<2x32xf32>
    %281 = math.exp %280 : vector<2x32xf32>
    %cst_56 = arith.constant 1.000000e+00 : f32
    %282 = vector.broadcast %cst_56 : f32 to vector<2x32xf32>
    %283 = arith.addf %282, %281 : vector<2x32xf32>
    %284 = arith.divf %282, %283 : vector<2x32xf32>
    %285 = vector.extract_strided_slice %272 {offsets = [0, 64], sizes = [2, 32], strides = [1, 1]} : vector<2x128xf32> to vector<2x32xf32>
    %286 = math.tanh %285 : vector<2x32xf32>
    %287 = vector.extract_strided_slice %272 {offsets = [0, 96], sizes = [2, 32], strides = [1, 1]} : vector<2x128xf32> to vector<2x32xf32>
    %288 = arith.negf %287 : vector<2x32xf32>
    %289 = math.exp %288 : vector<2x32xf32>
    %cst_57 = arith.constant 1.000000e+00 : f32
    %290 = vector.broadcast %cst_57 : f32 to vector<2x32xf32>
    %291 = arith.addf %290, %289 : vector<2x32xf32>
    %292 = arith.divf %290, %291 : vector<2x32xf32>
    %293 = arith.mulf %284, %267 : vector<2x32xf32>
    %294 = arith.mulf %278, %286 : vector<2x32xf32>
    %295 = arith.addf %293, %294 : vector<2x32xf32>
    %296 = math.tanh %295 : vector<2x32xf32>
    %297 = arith.mulf %292, %296 : vector<2x32xf32>
    %298 = vector.extract_strided_slice %239 {offsets = [4, 0], sizes = [2, 128], strides = [1, 1]} : vector<16x128xf32> to vector<2x128xf32>
    %cst_58 = arith.constant dense<0.000000e+00> : vector<2x128xf32>
    %299 = tpu.matmul %297, %234, %cst_58 {dimension_numbers = #tpu.dot_dimension_numbers<[1], [0], [0], [1], [0, 0, 1, 1], [], []>} : vector<2x32xf32>, vector<32x128xf32>, vector<2x128xf32> -> vector<2x128xf32>
    %300 = arith.addf %298, %299 : vector<2x128xf32>
    %301 = vector.extract_strided_slice %300 {offsets = [0, 0], sizes = [2, 32], strides = [1, 1]} : vector<2x128xf32> to vector<2x32xf32>
    %302 = arith.negf %301 : vector<2x32xf32>
    %303 = math.exp %302 : vector<2x32xf32>
    %cst_59 = arith.constant 1.000000e+00 : f32
    %304 = vector.broadcast %cst_59 : f32 to vector<2x32xf32>
    %305 = arith.addf %304, %303 : vector<2x32xf32>
    %306 = arith.divf %304, %305 : vector<2x32xf32>
    %307 = vector.extract_strided_slice %300 {offsets = [0, 32], sizes = [2, 32], strides = [1, 1]} : vector<2x128xf32> to vector<2x32xf32>
    %308 = arith.negf %307 : vector<2x32xf32>
    %309 = math.exp %308 : vector<2x32xf32>
    %cst_60 = arith.constant 1.000000e+00 : f32
    %310 = vector.broadcast %cst_60 : f32 to vector<2x32xf32>
    %311 = arith.addf %310, %309 : vector<2x32xf32>
    %312 = arith.divf %310, %311 : vector<2x32xf32>
    %313 = vector.extract_strided_slice %300 {offsets = [0, 64], sizes = [2, 32], strides = [1, 1]} : vector<2x128xf32> to vector<2x32xf32>
    %314 = math.tanh %313 : vector<2x32xf32>
    %315 = vector.extract_strided_slice %300 {offsets = [0, 96], sizes = [2, 32], strides = [1, 1]} : vector<2x128xf32> to vector<2x32xf32>
    %316 = arith.negf %315 : vector<2x32xf32>
    %317 = math.exp %316 : vector<2x32xf32>
    %cst_61 = arith.constant 1.000000e+00 : f32
    %318 = vector.broadcast %cst_61 : f32 to vector<2x32xf32>
    %319 = arith.addf %318, %317 : vector<2x32xf32>
    %320 = arith.divf %318, %319 : vector<2x32xf32>
    %321 = arith.mulf %312, %295 : vector<2x32xf32>
    %322 = arith.mulf %306, %314 : vector<2x32xf32>
    %323 = arith.addf %321, %322 : vector<2x32xf32>
    %324 = math.tanh %323 : vector<2x32xf32>
    %325 = arith.mulf %320, %324 : vector<2x32xf32>
    %326 = vector.extract_strided_slice %239 {offsets = [6, 0], sizes = [2, 128], strides = [1, 1]} : vector<16x128xf32> to vector<2x128xf32>
    %cst_62 = arith.constant dense<0.000000e+00> : vector<2x128xf32>
    %327 = tpu.matmul %325, %234, %cst_62 {dimension_numbers = #tpu.dot_dimension_numbers<[1], [0], [0], [1], [0, 0, 1, 1], [], []>} : vector<2x32xf32>, vector<32x128xf32>, vector<2x128xf32> -> vector<2x128xf32>
    %328 = arith.addf %326, %327 : vector<2x128xf32>
    %329 = vector.extract_strided_slice %328 {offsets = [0, 0], sizes = [2, 32], strides = [1, 1]} : vector<2x128xf32> to vector<2x32xf32>
    %330 = arith.negf %329 : vector<2x32xf32>
    %331 = math.exp %330 : vector<2x32xf32>
    %cst_63 = arith.constant 1.000000e+00 : f32
    %332 = vector.broadcast %cst_63 : f32 to vector<2x32xf32>
    %333 = arith.addf %332, %331 : vector<2x32xf32>
    %334 = arith.divf %332, %333 : vector<2x32xf32>
    %335 = vector.extract_strided_slice %328 {offsets = [0, 32], sizes = [2, 32], strides = [1, 1]} : vector<2x128xf32> to vector<2x32xf32>
    %336 = arith.negf %335 : vector<2x32xf32>
    %337 = math.exp %336 : vector<2x32xf32>
    %cst_64 = arith.constant 1.000000e+00 : f32
    %338 = vector.broadcast %cst_64 : f32 to vector<2x32xf32>
    %339 = arith.addf %338, %337 : vector<2x32xf32>
    %340 = arith.divf %338, %339 : vector<2x32xf32>
    %341 = vector.extract_strided_slice %328 {offsets = [0, 64], sizes = [2, 32], strides = [1, 1]} : vector<2x128xf32> to vector<2x32xf32>
    %342 = math.tanh %341 : vector<2x32xf32>
    %343 = vector.extract_strided_slice %328 {offsets = [0, 96], sizes = [2, 32], strides = [1, 1]} : vector<2x128xf32> to vector<2x32xf32>
    %344 = arith.negf %343 : vector<2x32xf32>
    %345 = math.exp %344 : vector<2x32xf32>
    %cst_65 = arith.constant 1.000000e+00 : f32
    %346 = vector.broadcast %cst_65 : f32 to vector<2x32xf32>
    %347 = arith.addf %346, %345 : vector<2x32xf32>
    %348 = arith.divf %346, %347 : vector<2x32xf32>
    %349 = arith.mulf %340, %323 : vector<2x32xf32>
    %350 = arith.mulf %334, %342 : vector<2x32xf32>
    %351 = arith.addf %349, %350 : vector<2x32xf32>
    %352 = math.tanh %351 : vector<2x32xf32>
    %353 = arith.mulf %348, %352 : vector<2x32xf32>
    %354 = vector.extract_strided_slice %239 {offsets = [8, 0], sizes = [2, 128], strides = [1, 1]} : vector<16x128xf32> to vector<2x128xf32>
    %cst_66 = arith.constant dense<0.000000e+00> : vector<2x128xf32>
    %355 = tpu.matmul %353, %234, %cst_66 {dimension_numbers = #tpu.dot_dimension_numbers<[1], [0], [0], [1], [0, 0, 1, 1], [], []>} : vector<2x32xf32>, vector<32x128xf32>, vector<2x128xf32> -> vector<2x128xf32>
    %356 = arith.addf %354, %355 : vector<2x128xf32>
    %357 = vector.extract_strided_slice %356 {offsets = [0, 0], sizes = [2, 32], strides = [1, 1]} : vector<2x128xf32> to vector<2x32xf32>
    %358 = arith.negf %357 : vector<2x32xf32>
    %359 = math.exp %358 : vector<2x32xf32>
    %cst_67 = arith.constant 1.000000e+00 : f32
    %360 = vector.broadcast %cst_67 : f32 to vector<2x32xf32>
    %361 = arith.addf %360, %359 : vector<2x32xf32>
    %362 = arith.divf %360, %361 : vector<2x32xf32>
    %363 = vector.extract_strided_slice %356 {offsets = [0, 32], sizes = [2, 32], strides = [1, 1]} : vector<2x128xf32> to vector<2x32xf32>
    %364 = arith.negf %363 : vector<2x32xf32>
    %365 = math.exp %364 : vector<2x32xf32>
    %cst_68 = arith.constant 1.000000e+00 : f32
    %366 = vector.broadcast %cst_68 : f32 to vector<2x32xf32>
    %367 = arith.addf %366, %365 : vector<2x32xf32>
    %368 = arith.divf %366, %367 : vector<2x32xf32>
    %369 = vector.extract_strided_slice %356 {offsets = [0, 64], sizes = [2, 32], strides = [1, 1]} : vector<2x128xf32> to vector<2x32xf32>
    %370 = math.tanh %369 : vector<2x32xf32>
    %371 = vector.extract_strided_slice %356 {offsets = [0, 96], sizes = [2, 32], strides = [1, 1]} : vector<2x128xf32> to vector<2x32xf32>
    %372 = arith.negf %371 : vector<2x32xf32>
    %373 = math.exp %372 : vector<2x32xf32>
    %cst_69 = arith.constant 1.000000e+00 : f32
    %374 = vector.broadcast %cst_69 : f32 to vector<2x32xf32>
    %375 = arith.addf %374, %373 : vector<2x32xf32>
    %376 = arith.divf %374, %375 : vector<2x32xf32>
    %377 = arith.mulf %368, %351 : vector<2x32xf32>
    %378 = arith.mulf %362, %370 : vector<2x32xf32>
    %379 = arith.addf %377, %378 : vector<2x32xf32>
    %380 = math.tanh %379 : vector<2x32xf32>
    %381 = arith.mulf %376, %380 : vector<2x32xf32>
    %382 = vector.extract_strided_slice %239 {offsets = [10, 0], sizes = [2, 128], strides = [1, 1]} : vector<16x128xf32> to vector<2x128xf32>
    %cst_70 = arith.constant dense<0.000000e+00> : vector<2x128xf32>
    %383 = tpu.matmul %381, %234, %cst_70 {dimension_numbers = #tpu.dot_dimension_numbers<[1], [0], [0], [1], [0, 0, 1, 1], [], []>} : vector<2x32xf32>, vector<32x128xf32>, vector<2x128xf32> -> vector<2x128xf32>
    %384 = arith.addf %382, %383 : vector<2x128xf32>
    %385 = vector.extract_strided_slice %384 {offsets = [0, 0], sizes = [2, 32], strides = [1, 1]} : vector<2x128xf32> to vector<2x32xf32>
    %386 = arith.negf %385 : vector<2x32xf32>
    %387 = math.exp %386 : vector<2x32xf32>
    %cst_71 = arith.constant 1.000000e+00 : f32
    %388 = vector.broadcast %cst_71 : f32 to vector<2x32xf32>
    %389 = arith.addf %388, %387 : vector<2x32xf32>
    %390 = arith.divf %388, %389 : vector<2x32xf32>
    %391 = vector.extract_strided_slice %384 {offsets = [0, 32], sizes = [2, 32], strides = [1, 1]} : vector<2x128xf32> to vector<2x32xf32>
    %392 = arith.negf %391 : vector<2x32xf32>
    %393 = math.exp %392 : vector<2x32xf32>
    %cst_72 = arith.constant 1.000000e+00 : f32
    %394 = vector.broadcast %cst_72 : f32 to vector<2x32xf32>
    %395 = arith.addf %394, %393 : vector<2x32xf32>
    %396 = arith.divf %394, %395 : vector<2x32xf32>
    %397 = vector.extract_strided_slice %384 {offsets = [0, 64], sizes = [2, 32], strides = [1, 1]} : vector<2x128xf32> to vector<2x32xf32>
    %398 = math.tanh %397 : vector<2x32xf32>
    %399 = vector.extract_strided_slice %384 {offsets = [0, 96], sizes = [2, 32], strides = [1, 1]} : vector<2x128xf32> to vector<2x32xf32>
    %400 = arith.negf %399 : vector<2x32xf32>
    %401 = math.exp %400 : vector<2x32xf32>
    %cst_73 = arith.constant 1.000000e+00 : f32
    %402 = vector.broadcast %cst_73 : f32 to vector<2x32xf32>
    %403 = arith.addf %402, %401 : vector<2x32xf32>
    %404 = arith.divf %402, %403 : vector<2x32xf32>
    %405 = arith.mulf %396, %379 : vector<2x32xf32>
    %406 = arith.mulf %390, %398 : vector<2x32xf32>
    %407 = arith.addf %405, %406 : vector<2x32xf32>
    %408 = math.tanh %407 : vector<2x32xf32>
    %409 = arith.mulf %404, %408 : vector<2x32xf32>
    %410 = vector.extract_strided_slice %239 {offsets = [12, 0], sizes = [2, 128], strides = [1, 1]} : vector<16x128xf32> to vector<2x128xf32>
    %cst_74 = arith.constant dense<0.000000e+00> : vector<2x128xf32>
    %411 = tpu.matmul %409, %234, %cst_74 {dimension_numbers = #tpu.dot_dimension_numbers<[1], [0], [0], [1], [0, 0, 1, 1], [], []>} : vector<2x32xf32>, vector<32x128xf32>, vector<2x128xf32> -> vector<2x128xf32>
    %412 = arith.addf %410, %411 : vector<2x128xf32>
    %413 = vector.extract_strided_slice %412 {offsets = [0, 0], sizes = [2, 32], strides = [1, 1]} : vector<2x128xf32> to vector<2x32xf32>
    %414 = arith.negf %413 : vector<2x32xf32>
    %415 = math.exp %414 : vector<2x32xf32>
    %cst_75 = arith.constant 1.000000e+00 : f32
    %416 = vector.broadcast %cst_75 : f32 to vector<2x32xf32>
    %417 = arith.addf %416, %415 : vector<2x32xf32>
    %418 = arith.divf %416, %417 : vector<2x32xf32>
    %419 = vector.extract_strided_slice %412 {offsets = [0, 32], sizes = [2, 32], strides = [1, 1]} : vector<2x128xf32> to vector<2x32xf32>
    %420 = arith.negf %419 : vector<2x32xf32>
    %421 = math.exp %420 : vector<2x32xf32>
    %cst_76 = arith.constant 1.000000e+00 : f32
    %422 = vector.broadcast %cst_76 : f32 to vector<2x32xf32>
    %423 = arith.addf %422, %421 : vector<2x32xf32>
    %424 = arith.divf %422, %423 : vector<2x32xf32>
    %425 = vector.extract_strided_slice %412 {offsets = [0, 64], sizes = [2, 32], strides = [1, 1]} : vector<2x128xf32> to vector<2x32xf32>
    %426 = math.tanh %425 : vector<2x32xf32>
    %427 = vector.extract_strided_slice %412 {offsets = [0, 96], sizes = [2, 32], strides = [1, 1]} : vector<2x128xf32> to vector<2x32xf32>
    %428 = arith.negf %427 : vector<2x32xf32>
    %429 = math.exp %428 : vector<2x32xf32>
    %cst_77 = arith.constant 1.000000e+00 : f32
    %430 = vector.broadcast %cst_77 : f32 to vector<2x32xf32>
    %431 = arith.addf %430, %429 : vector<2x32xf32>
    %432 = arith.divf %430, %431 : vector<2x32xf32>
    %433 = arith.mulf %424, %407 : vector<2x32xf32>
    %434 = arith.mulf %418, %426 : vector<2x32xf32>
    %435 = arith.addf %433, %434 : vector<2x32xf32>
    %436 = math.tanh %435 : vector<2x32xf32>
    %437 = arith.mulf %432, %436 : vector<2x32xf32>
    %438 = vector.extract_strided_slice %239 {offsets = [14, 0], sizes = [2, 128], strides = [1, 1]} : vector<16x128xf32> to vector<2x128xf32>
    %cst_78 = arith.constant dense<0.000000e+00> : vector<2x128xf32>
    %439 = tpu.matmul %437, %234, %cst_78 {dimension_numbers = #tpu.dot_dimension_numbers<[1], [0], [0], [1], [0, 0, 1, 1], [], []>} : vector<2x32xf32>, vector<32x128xf32>, vector<2x128xf32> -> vector<2x128xf32>
    %440 = arith.addf %438, %439 : vector<2x128xf32>
    %441 = vector.extract_strided_slice %440 {offsets = [0, 0], sizes = [2, 32], strides = [1, 1]} : vector<2x128xf32> to vector<2x32xf32>
    %442 = arith.negf %441 : vector<2x32xf32>
    %443 = math.exp %442 : vector<2x32xf32>
    %cst_79 = arith.constant 1.000000e+00 : f32
    %444 = vector.broadcast %cst_79 : f32 to vector<2x32xf32>
    %445 = arith.addf %444, %443 : vector<2x32xf32>
    %446 = arith.divf %444, %445 : vector<2x32xf32>
    %447 = vector.extract_strided_slice %440 {offsets = [0, 32], sizes = [2, 32], strides = [1, 1]} : vector<2x128xf32> to vector<2x32xf32>
    %448 = arith.negf %447 : vector<2x32xf32>
    %449 = math.exp %448 : vector<2x32xf32>
    %cst_80 = arith.constant 1.000000e+00 : f32
    %450 = vector.broadcast %cst_80 : f32 to vector<2x32xf32>
    %451 = arith.addf %450, %449 : vector<2x32xf32>
    %452 = arith.divf %450, %451 : vector<2x32xf32>
    %453 = vector.extract_strided_slice %440 {offsets = [0, 64], sizes = [2, 32], strides = [1, 1]} : vector<2x128xf32> to vector<2x32xf32>
    %454 = math.tanh %453 : vector<2x32xf32>
    %455 = vector.extract_strided_slice %440 {offsets = [0, 96], sizes = [2, 32], strides = [1, 1]} : vector<2x128xf32> to vector<2x32xf32>
    %456 = arith.negf %455 : vector<2x32xf32>
    %457 = math.exp %456 : vector<2x32xf32>
    %cst_81 = arith.constant 1.000000e+00 : f32
    %458 = vector.broadcast %cst_81 : f32 to vector<2x32xf32>
    %459 = arith.addf %458, %457 : vector<2x32xf32>
    %460 = arith.divf %458, %459 : vector<2x32xf32>
    %461 = arith.mulf %452, %435 : vector<2x32xf32>
    %462 = arith.mulf %446, %454 : vector<2x32xf32>
    %463 = arith.addf %461, %462 : vector<2x32xf32>
    %464 = math.tanh %463 : vector<2x32xf32>
    %465 = arith.mulf %460, %464 : vector<2x32xf32>
    %466 = tpu.concatenate %269, %297, %325, %353, %381, %409, %437, %465 in 0 : vector<2x32xf32>, vector<2x32xf32>, vector<2x32xf32>, vector<2x32xf32>, vector<2x32xf32>, vector<2x32xf32>, vector<2x32xf32>, vector<2x32xf32> -> vector<16x32xf32>
    %c0_82 = arith.constant 0 : index
    %c0_83 = arith.constant 0 : index
    %467 = vector.load %arg7[%c0_82, %c0_83] : memref<32x1xf32, #tpu.memory_space<vmem>>, vector<32x1xf32>
    %cst_84 = arith.constant dense<0.000000e+00> : vector<16x1xf32>
    %468 = tpu.matmul %466, %467, %cst_84 {dimension_numbers = #tpu.dot_dimension_numbers<[1], [0], [0], [1], [0, 0, 1, 1], [], []>} : vector<16x32xf32>, vector<32x1xf32>, vector<16x1xf32> -> vector<16x1xf32>
    %c0_85 = arith.constant 0 : index
    %c0_86 = arith.constant 0 : index
    %469 = vector.load %arg8[%c0_85, %c0_86] : memref<1x1xf32, #tpu.memory_space<vmem>>, vector<1x1xf32>
    %470 = vector.broadcast %469 : vector<1x1xf32> to vector<16x1xf32>
    %471 = arith.addf %468, %470 : vector<16x1xf32>
    %c0_87 = arith.constant 0 : index
    %c0_88 = arith.constant 0 : index
    %472 = vector.load %arg9[%c0_87, %c0_88] : memref<16x1xf32, #tpu.memory_space<vmem>>, vector<16x1xf32>
    tpu.vector_store %arg9[%c0_87, %c0_88], %471 {strides = array<i32>} : memref<16x1xf32, #tpu.memory_space<vmem>>, vector<16x1xf32>,
    return
  }
}

</mosaic_0001>

<bundles_post_ra>
// kernel: tpu_custom_call.1
= control target key start
LH: loop header
LB: loop body
LE: loop exit
PB: predicated region body
PF: predicated region fallthrough
CT: control target
= control target key end

     0   :  { %s3087_s0 = inlined_call_operand.vmem [shape: f32[16,8], index: 0, kind: input, shape index: {}]   ;;  %s3088_s1 = inlined_call_operand.hbm [shape: f32[8,128], index: 1, kind: input, shape index: {}]   ;;  %s3089_s2 = inlined_call_operand.vmem [shape: f32[32,128], index: 2, kind: input, shape index: {}]   ;;  %s3090_s3 = inlined_call_operand.vmem [shape: f32[1,128], index: 3, kind: input, shape index: {}]   ;;  %s3091_s4 = inlined_call_operand.vmem [shape: f32[32,128], index: 4, kind: input, shape index: {}]   ;;  %s3092_s5 = inlined_call_operand.hbm [shape: f32[32,128], index: 5, kind: input, shape index: {}]   ;;  %s3093_s6 = inlined_call_operand.vmem [shape: f32[1,128], index: 6, kind: input, shape index: {}]   ;;  %s3094_s7 = inlined_call_operand.vmem [shape: f32[32,1], index: 7, kind: input, shape index: {}]   ;;  %s3095_s8 = inlined_call_operand.<no memory space> [shape: f32[1,1], index: 8, kind: input, shape index: {}]   ;;  %s3096_s9 = inlined_call_operand.vmem [shape: f32[16,1], index: 9, kind: output, shape index: {}]  }
   0x1   :  { %v14_v0 = vstv %s3095_s8 }
   0x2   :  { %15 = vst [vmem:[#allocation2] sm:$0x1] %v14_v0 }
   0x3   :  { %16 = vsyncpa [#allocation4], 0 }
   0x4   :  { %17 = vsyncpa [#allocation6], 0  ;;  %s2692_s11 = smov [#allocation3]   ;;  %s2693_s13 = smov [#allocation5]  }
   0x5   :  { %s26_s12 = sshll.u32 %s2692_s11, 4  ;;  %s41_s14 = sshll.u32 %s2693_s13, 4  ;;  %s27_s12 = int_to_ptr.vmem [resolvable:$true] %s26_s12  ;;  %s2754_s14 = int_to_ptr.vmem [resolvable:$true] %s41_s14 }
   0x6   :  { %s2644_s17 = scalar_lea.hbm %s3088_s1, 128 }
   0x7   :  { %p2645_p0 = scmp.ne.s32.totalorder %s3088_s1, %s2644_s17  ;;  %p2648_p1 = scmp.lt.u32.totalorder %s2644_s17, %s3088_s1 }
   0x9   :  { %p2650_p2 = pnand %p2648_p1, %p2645_p0 }
   0xb   :  { %2653 = shalt.err (!%p2650_p2)
}
   0xc   :  { %s2654_s21 = scalar_lea.vmem %s27_s12, 128  ;;  %p2659_p4 = scmp.lt.s32.totalorder %s27_s12, %s27_s12 }
   0xd   :  { %p2655_p3 = scmp.ne.s32.totalorder %s27_s12, %s2654_s21  ;;  %p2660_p5 = scmp.lt.s32.totalorder %s2654_s21, %s2654_s21 }
   0xf   :  { %p2661_p6 = por %p2660_p5, %p2659_p4 }
  0x11   :  { %p2662_p7 = pnand %p2661_p6, %p2655_p3 }
  0x13   :  { %2665 = shalt.err (!%p2662_p7)
}
  0x14   :  { %29 = dma.hbm_to_vmem [thread:$0]  %s3088_s1, 128, %s27_s12, [#allocation4]  }
  0x15   :  { %s2666_s26 = scalar_lea.hbm %s3092_s5, 512 }
  0x16   :  { %p2667_p8 = scmp.ne.s32.totalorder %s3092_s5, %s2666_s26  ;;  %p2670_p9 = scmp.lt.u32.totalorder %s2666_s26, %s3092_s5 }
  0x18   :  { %p2672_p10 = pnand %p2670_p9, %p2667_p8 }
  0x1a   :  { %2675 = shalt.err (!%p2672_p10)
}
  0x1b   :  { %s2676_s10 = scalar_lea.vmem %s2754_s14, 512  ;;  %p2681_p12 = scmp.lt.s32.totalorder %s2754_s14, %s2754_s14 }
  0x1c   :  { %p2677_p11 = scmp.ne.s32.totalorder %s2754_s14, %s2676_s10  ;;  %p2682_p13 = scmp.lt.s32.totalorder %s2676_s10, %s2676_s10 }
  0x1e   :  { %p2683_p0 = por %p2682_p13, %p2681_p12 }
  0x20   :  { %p2684_p1 = pnand %p2683_p0, %p2677_p11 }
  0x22   :  { %2687 = shalt.err (!%p2684_p1)
}
  0x23   :  { %s2694_s1 = smov 128   ;;  %s2695_s11 = smov 8  }
  0x24   :  { %47 = dma.hbm_to_vmem [thread:$0]  %s3092_s5, 512, %s2754_s14, [#allocation6], %s2694_s1, %s2694_s1, %s2695_s11  }
  0x25   :  { %2688 = dma.done.wait [#allocation4], 128  }
  0x26   :  { %2689 = vsyncadd [#allocation4], 4294967168 }
  0x27   :  { %2690 = dma.done.wait [#allocation6], 512  }
  0x28   :  { %2691 = vsyncadd [#allocation6], 4294966784  ;;  %v2696_v1 = vmov 0.0|0.0   ;;  %vm2697_vm0 = vmmov 0   ;;  %v2698_v2 = vmov 0.0   ;;  %vm74_vm1 = vcmask 64512  }
  0x29   :  { %2395 = vmatprep.subr.bf16.mxu1 %v2696_v1  ;;  %2205 = vmatprep.mubr.msk.f32.mxu1 %vm2697_vm0, %v2698_v2  ;;  %v62_v3 = vld [vmem:[%s3089_s2] sm:$0xff]  ;;  %v63_v4 = vld [vmem:[%s3089_s2 + $0x8] sm:$0xff]  ;;  %v64_v9 = vld [vmem:[%s3089_s2 + $0x10] sm:$0xff]  ;;  %s2699_s24 = smov 64   ;;  %vm156_vm2 = vcmask 261120   ;;  %vm999_vm3 = vcmask 1041408  }
  0x2a   :  { %v66_v5 = vld [vmem:[#allocation3] sm:$0xff]  ;;  %v2794_v6 = vpack.c.bf16 %v63_v4, %v62_v3  ;;  %v65_v10 = vld [vmem:[%s3089_s2 + $0x18] sm:$0xff]  ;;  %v2058_v12 = vld [vmem:[%s3090_s3] ss:$0 sm:$0xff]  ;;  %s2700_s3 = smov 32   ;;  %vm1001_vm4 = vcmask 1043456  }
  0x2b   :  { %2192 = vmatprep.subr.mxu0 %v66_v5  ;;  %v60_v7 = vld [vmem:[%s3087_s0] sm:$0xff]  ;;  %v61_v8 = vld [vmem:[%s3087_s0 + $0x8] sm:$0xff]  ;;  %v2809_v11 = vpack.c.bf16 %v65_v10, %v64_v9  ;;  %vm1003_vm5 = vcmask 1045504   ;;  %vm2049_vm6 = vcmask 7168  }
  0x2c   :  { %2193 = vmatpush3.msra.mxu0 %v66_v5  ;;  %2194 = vmatprep.mubr.msk.f32.mxu0 %vm74_vm1, %v60_v7 }
  0x2d   :  { %2397 = vmatpush3.bf16.msra.mxu1 %v2794_v6  ;;  %2195 = vmatmul.mubr.msk.f32.vlgmr.msra.gmra.mrb[0].mxu0 %vm74_vm1, %v61_v8 }
  0x2e   :  { %2398 = vmatprep.subr.bf16.mxu1 %v2696_v1  ;;  %2401 = vmatprep.subr.bf16.mxu0 %v2696_v1 }
  0x2f   :  { %2403 = vmatpush3.bf16.msra.mxu0 %v2794_v6  ;;  %2216 = vmatprep.mubr.msk.f32.mxu0 %vm2697_vm0, %v2698_v2 }
  0x30   :  { %2404 = vmatprep.subr.bf16.mxu0 %v2696_v1 }
  0x31   :  { %2400 = vmatpush3.bf16.msra.mxu1 %v2809_v11 }
  0x32   :  { %2407 = vmatprep.subr.bf16.mxu1 %v2696_v1 }
  0x33   :  { %2406 = vmatpush3.bf16.msra.mxu0 %v2809_v11 }
  0x34   :  { %2206 = vmatmul.mubr.f32.vlgmr.msra.gmra.mrb[0].mxu1 %v2698_v2  ;;  %2413 = vmatprep.subr.bf16.mxu0 %v2696_v1 }
  0x35   :  { %2409 = vmatpush3.bf16.msra.mxu1 %v2794_v6  ;;  %2227 = vmatprep.mubr.msk.f32.mxu1 %vm2697_vm0, %v2698_v2 }
  0x36   :  { %2410 = vmatprep.subr.bf16.mxu1 %v2696_v1 }
  0x39   :  { %2412 = vmatpush3.bf16.msra.mxu1 %v2809_v11 }
  0x3a   :  { %2419 = vmatprep.subr.bf16.mxu1 %v2696_v1 }
 0x100   :  { %v2196_v13 = vpop.f32.mrb[0].mxu0 }
 0x101   :  { %v2831_v14 = vadd.f32 %v2196_v13, %v2058_v12  ;;  %v147_v15 = vpop.f32.mrb[1].mxu0 }
 0x102   :  { %v2833_v16 = vadd.f32 %v2058_v12, %v147_v15 }
 0x107   :  { %v226_v17 = vpop.f32.mrb[0].mxu1 }
 0x108   :  { %v230_v18 = vadd.f32 %v226_v17, %v2833_v16  ;;  %v2207_v19 = vpop.f32.mrb[1].mxu1 }
 0x10a   :  { %2516 = vtanh.f32 %v230_v18  ;;  %v2061_v21 = vmul.f32 -1.442695, %v230_v18 }
 0x10c   :  { %2518 = vpow2.f32 %v2061_v21 }
 0x114   :  { %v2517_v20 = vpop.eup %2516 }
 0x115   :  { %240 = vrot.lane.b32.xlu0 %v2517_v20, %s2699_s24 }
 0x116   :  { %v2519_v22 = vpop.eup %2518 }
 0x117   :  { %v234_v23 = vadd.f32 1.0, %v2519_v22 }
 0x119   :  { %2520 = vrcp.f32 %v234_v23 }
 0x123   :  { %v2521_v24 = vpop.eup %2520 }
 0x124   :  { %v238_v27 = vmul.f32 0.0, %v2521_v24 }
 0x187   :  { %v241_v25 = vpop.permute.xlu0 %240 }
 0x188   :  { %v243_v26 = vmul.f32 %v2521_v24, %v241_v25 }
 0x18a   :  { %245 = vrot.lane.b32.xlu0 %v243_v26, %s2700_s3 }
 0x1fc   :  { %v246_v28 = vpop.permute.xlu0 %245 }
 0x1fd   :  { %v248_v29 = vadd.f32 %v246_v28, %v238_v27 }
 0x1ff   :  { %2522 = vtanh.f32 %v248_v29  ;;  %v342_v45 = vrot.slane %v248_v29, 6 }
 0x209   :  { %v2523_v30 = vpop.eup %2522 }
 0x20a   :  { %251 = vrot.lane.b32.xlu1 %v2523_v30, %s2699_s24 }
 0x27c   :  { %v252_v31 = vpop.permute.xlu1 %251 }
 0x27d   :  { %v2839_v32 = vmul.f32 %v2521_v24, %v252_v31 }
 0x27f   :  { %256 = vrot.lane.b32.xlu1 %v2839_v32, %s2700_s3 }
 0x2f1   :  { %v257_v33 = vpop.permute.xlu1 %256 }
 0x2f2   :  { %2217 = vmatmul.mubr.msk.f32.vlgmr.msra.gmra.mrb[2].mxu0 %vm156_vm2, %v257_v33 }
 0x2f3   :  { %2415 = vmatpush3.bf16.msra.mxu0 %v2794_v6  ;;  %2238 = vmatprep.mubr.msk.f32.mxu0 %vm2697_vm0, %v2698_v2 }
 0x2f4   :  { %2416 = vmatprep.subr.bf16.mxu0 %v2696_v1 }
 0x2f7   :  { %2418 = vmatpush3.bf16.msra.mxu0 %v2809_v11 }
 0x2f8   :  { %2425 = vmatprep.subr.bf16.mxu0 %v2696_v1 }
 0x3c5   :  { %v326_v34 = vpop.f32.mrb[2].mxu0 }
 0x3c6   :  { %v331_v35 = vrot.slane %v326_v34, 6  ;;  %v2218_v36 = vpop.f32.mrb[3].mxu0 }
 0x3c8   :  { %v333_v37 = vadd.f32 %v331_v35, %v2833_v16 }
 0x3ca   :  { %2524 = vtanh.f32 %v333_v37  ;;  %v2063_v39 = vmul.f32 -1.442695, %v333_v37 }
 0x3cc   :  { %2526 = vpow2.f32 %v2063_v39 }
 0x3d4   :  { %v2525_v38 = vpop.eup %2524 }
 0x3d5   :  { %346 = vrot.lane.b32.xlu0 %v2525_v38, %s2699_s24 }
 0x3d6   :  { %v2527_v40 = vpop.eup %2526 }
 0x3d7   :  { %v337_v41 = vadd.f32 1.0, %v2527_v40 }
 0x3d9   :  { %2528 = vrcp.f32 %v337_v41 }
 0x3e3   :  { %v2529_v42 = vpop.eup %2528 }
 0x3e4   :  { %v344_v46 = vmul.f32 %v2529_v42, %v342_v45 }
 0x447   :  { %v347_v43 = vpop.permute.xlu0 %346 }
 0x448   :  { %v349_v44 = vmul.f32 %v2529_v42, %v347_v43 }
 0x44a   :  { %351 = vrot.lane.b32.xlu1 %v349_v44, %s2700_s3 }
 0x4bc   :  { %v352_v47 = vpop.permute.xlu1 %351 }
 0x4bd   :  { %v354_v48 = vadd.f32 %v352_v47, %v344_v46 }
 0x4bf   :  { %2530 = vtanh.f32 %v354_v48  ;;  %v449_v3 = vrot.slane %v354_v48, 6 }
 0x4c9   :  { %v2531_v49 = vpop.eup %2530 }
 0x4ca   :  { %357 = vrot.lane.b32.xlu0 %v2531_v49, %s2699_s24 }
 0x53c   :  { %v358_v50 = vpop.permute.xlu0 %357 }
 0x53d   :  { %v360_v51 = vmul.f32 %v2529_v42, %v358_v50 }
 0x53f   :  { %v362_v52 = vrot.slane %v360_v51, 2  ;;  %v1000_v12 = vsel %vm999_vm3, %v2839_v32, %v360_v51 }
 0x541   :  { %363 = vrot.lane.b32.xlu1 %v362_v52, %s2700_s3 }
 0x5b3   :  { %v364_v53 = vpop.permute.xlu1 %363 }
 0x5b4   :  { %2228 = vmatmul.mubr.msk.f32.vlgmr.msra.gmra.mrb[2].mxu1 %vm156_vm2, %v364_v53 }
 0x5b5   :  { %2421 = vmatpush3.bf16.msra.mxu1 %v2794_v6  ;;  %2249 = vmatprep.mubr.msk.f32.mxu1 %vm2697_vm0, %v2698_v2 }
 0x5b6   :  { %2422 = vmatprep.subr.bf16.mxu1 %v2696_v1 }
 0x5b9   :  { %2424 = vmatpush3.bf16.msra.mxu1 %v2809_v11 }
 0x5ba   :  { %2431 = vmatprep.subr.bf16.mxu1 %v2696_v1 }
 0x687   :  { %v433_v54 = vpop.f32.mrb[2].mxu1 }
 0x688   :  { %v438_v55 = vrot.slane %v433_v54, 4  ;;  %v2229_v56 = vpop.f32.mrb[3].mxu1 }
 0x68a   :  { %v440_v57 = vadd.f32 %v438_v55, %v2833_v16 }
 0x68c   :  { %2532 = vtanh.f32 %v440_v57  ;;  %v2065_v59 = vmul.f32 -1.442695, %v440_v57 }
 0x68e   :  { %2534 = vpow2.f32 %v2065_v59 }
 0x696   :  { %v2533_v58 = vpop.eup %2532 }
 0x697   :  { %453 = vrot.lane.b32.xlu0 %v2533_v58, %s2699_s24 }
 0x698   :  { %v2535_v60 = vpop.eup %2534 }
 0x699   :  { %v444_v61 = vadd.f32 1.0, %v2535_v60 }
 0x69b   :  { %2536 = vrcp.f32 %v444_v61 }
 0x6a5   :  { %v2537_v62 = vpop.eup %2536 }
 0x6a6   :  { %v451_v4 = vmul.f32 %v2537_v62, %v449_v3 }
 0x709   :  { %v454_v63 = vpop.permute.xlu0 %453 }
 0x70a   :  { %v456_v0 = vmul.f32 %v2537_v62, %v454_v63 }
 0x70c   :  { %458 = vrot.lane.b32.xlu1 %v456_v0, %s2700_s3 }
 0x77e   :  { %v459_v5 = vpop.permute.xlu1 %458 }
 0x77f   :  { %v461_v7 = vadd.f32 %v459_v5, %v451_v4 }
 0x781   :  { %2538 = vtanh.f32 %v461_v7  ;;  %v556_v29 = vrot.slane %v461_v7, 6 }
 0x78b   :  { %v2539_v8 = vpop.eup %2538 }
 0x78c   :  { %464 = vrot.lane.b32.xlu0 %v2539_v8, %s2699_s24 }
 0x7fe   :  { %v465_v9 = vpop.permute.xlu0 %464 }
 0x7ff   :  { %v467_v10 = vmul.f32 %v2537_v62, %v465_v9 }
 0x801   :  { %v469_v13 = vrot.slane %v467_v10, 4  ;;  %v1002_v15 = vsel %vm1001_vm4, %v1000_v12, %v467_v10 }
 0x803   :  { %470 = vrot.lane.b32.xlu1 %v469_v13, %s2700_s3 }
 0x875   :  { %v471_v17 = vpop.permute.xlu1 %470 }
 0x876   :  { %2239 = vmatmul.mubr.msk.f32.vlgmr.msra.gmra.mrb[4].mxu0 %vm156_vm2, %v471_v17 }
 0x877   :  { %2427 = vmatpush3.bf16.msra.mxu0 %v2794_v6  ;;  %2260 = vmatprep.mubr.msk.f32.mxu0 %vm2697_vm0, %v2698_v2 }
 0x878   :  { %2428 = vmatprep.subr.bf16.mxu0 %v2696_v1 }
 0x87b   :  { %2430 = vmatpush3.bf16.msra.mxu0 %v2809_v11 }
 0x87c   :  { %2437 = vmatprep.subr.bf16.mxu0 %v2696_v1 }
 0x949   :  { %v540_v18 = vpop.f32.mrb[4].mxu0 }
 0x94a   :  { %v545_v19 = vrot.slane %v540_v18, 2  ;;  %v2240_v20 = vpop.f32.mrb[5].mxu0 }
 0x94c   :  { %v547_v21 = vadd.f32 %v545_v19, %v2833_v16 }
 0x94e   :  { %2540 = vtanh.f32 %v547_v21  ;;  %v2067_v23 = vmul.f32 -1.442695, %v547_v21 }
 0x950   :  { %2542 = vpow2.f32 %v2067_v23 }
 0x958   :  { %v2541_v22 = vpop.eup %2540 }
 0x959   :  { %560 = vrot.lane.b32.xlu0 %v2541_v22, %s2699_s24 }
 0x95a   :  { %v2543_v24 = vpop.eup %2542 }
 0x95b   :  { %v551_v25 = vadd.f32 1.0, %v2543_v24 }
 0x95d   :  { %2544 = vrcp.f32 %v551_v25 }
 0x967   :  { %v2545_v26 = vpop.eup %2544 }
 0x968   :  { %v558_v30 = vmul.f32 %v2545_v26, %v556_v29 }
 0x9cb   :  { %v561_v27 = vpop.permute.xlu0 %560 }
 0x9cc   :  { %v563_v28 = vmul.f32 %v2545_v26, %v561_v27 }
 0x9ce   :  { %565 = vrot.lane.b32.xlu1 %v563_v28, %s2700_s3 }
 0xa40   :  { %v566_v31 = vpop.permute.xlu1 %565 }
 0xa41   :  { %v568_v32 = vadd.f32 %v566_v31, %v558_v30 }
 0xa43   :  { %2546 = vtanh.f32 %v568_v32  ;;  %v660_v48 = vrot.slane %v568_v32, 6 }
 0xa4d   :  { %v2547_v16 = vpop.eup %2546 }
 0xa4e   :  { %571 = vrot.lane.b32.xlu0 %v2547_v16, %s2699_s24 }
 0xac0   :  { %v572_v33 = vpop.permute.xlu0 %571 }
 0xac1   :  { %v574_v34 = vmul.f32 %v2545_v26, %v572_v33 }
 0xac3   :  { %v576_v35 = vrot.slane %v574_v34, 6  ;;  %v2882_v36 = vsel %vm1003_vm5, %v1002_v15, %v574_v34 }
 0xac5   :  { %577 = vrot.lane.b32.xlu1 %v576_v35, %s2700_s3 }
 0xb37   :  { %v578_v37 = vpop.permute.xlu1 %577 }
 0xb38   :  { %2250 = vmatmul.mubr.msk.f32.vlgmr.msra.gmra.mrb[4].mxu1 %vm156_vm2, %v578_v37 }
 0xb39   :  { %2433 = vmatpush3.bf16.msra.mxu1 %v2794_v6  ;;  %2271 = vmatprep.mubr.msk.f32.mxu1 %vm2697_vm0, %v2698_v2 }
 0xb3a   :  { %2434 = vmatprep.subr.bf16.mxu1 %v2696_v1 }
 0xb3d   :  { %2436 = vmatpush3.bf16.msra.mxu1 %v2809_v11 }
 0xc0b   :  { %v647_v38 = vpop.f32.mrb[4].mxu1 }
 0xc0c   :  { %v651_v39 = vadd.f32 %v647_v38, %v2831_v14  ;;  %v2251_v40 = vpop.f32.mrb[5].mxu1 }
 0xc0e   :  { %2548 = vtanh.f32 %v651_v39  ;;  %v2069_v42 = vmul.f32 -1.442695, %v651_v39 }
 0xc10   :  { %2550 = vpow2.f32 %v2069_v42 }
 0xc18   :  { %v2549_v41 = vpop.eup %2548 }
 0xc19   :  { %664 = vrot.lane.b32.xlu0 %v2549_v41, %s2699_s24 }
 0xc1a   :  { %v2551_v43 = vpop.eup %2550 }
 0xc1b   :  { %v655_v44 = vadd.f32 1.0, %v2551_v43 }
 0xc1d   :  { %2552 = vrcp.f32 %v655_v44 }
 0xc27   :  { %v2553_v45 = vpop.eup %2552 }
 0xc28   :  { %v662_v49 = vmul.f32 %v2553_v45, %v660_v48 }
 0xc8b   :  { %v665_v46 = vpop.permute.xlu0 %664 }
 0xc8c   :  { %v667_v47 = vmul.f32 %v2553_v45, %v665_v46 }
 0xc8e   :  { %669 = vrot.lane.b32.xlu1 %v667_v47, %s2700_s3 }
 0xd00   :  { %v670_v50 = vpop.permute.xlu1 %669 }
 0xd01   :  { %v672_v51 = vadd.f32 %v670_v50, %v662_v49 }
 0xd03   :  { %2554 = vtanh.f32 %v672_v51 }
 0xd0d   :  { %v2555_v52 = vpop.eup %2554 }
 0xd0e   :  { %675 = vrot.lane.b32.xlu0 %v2555_v52, %s2699_s24 }
 0xd80   :  { %v676_v53 = vpop.permute.xlu0 %675 }
 0xd81   :  { %v2895_v54 = vmul.f32 %v2553_v45, %v676_v53  ;;  %v1012_v53 = vld [vmem:[%s3091_s4] sm:$0xff] }
 0xd83   :  { %680 = vrot.lane.b32.xlu1 %v2895_v54, %s2700_s3 }
 0xdf5   :  { %v681_v55 = vpop.permute.xlu1 %680 }
 0xdf6   :  { %2261 = vmatmul.mubr.msk.f32.vlgmr.msra.gmra.mrb[6].mxu0 %vm156_vm2, %v681_v55  ;;  %v1008_v55 = vld [vmem:[#allocation5] sm:$0xff] }
 0xdf7   :  { %2439 = vmatpush3.bf16.msra.mxu0 %v2794_v6  ;;  %2282 = vmatprep.mubr.msk.f32.mxu0 %vm2697_vm0, %v2698_v2 }
 0xdf8   :  { %2440 = vmatprep.subr.bf16.mxu0 %v2696_v1 }
 0xdfb   :  { %2442 = vmatpush3.bf16.msra.mxu0 %v2809_v11  ;;  %v766_v11 = vrot.slane %v672_v51, 6 }
 0xdfc   :  { %2451 = vmatprep.subr.bf16.mxu0 %v2696_v1 }
 0xec9   :  { %v750_v56 = vpop.f32.mrb[6].mxu0 }
 0xeca   :  { %v755_v57 = vrot.slane %v750_v56, 6  ;;  %v2262_v58 = vpop.f32.mrb[7].mxu0 }
 0xecb   :  { %v1015_v58 = vld [vmem:[%s3091_s4 + $0x18] sm:$0xff] }
 0xecc   :  { %v757_v59 = vadd.f32 %v755_v57, %v2831_v14  ;;  %v1009_v57 = vld [vmem:[#allocation5 + $0x8] sm:$0xff] }
 0xece   :  { %2556 = vtanh.f32 %v757_v59  ;;  %v2071_v61 = vmul.f32 -1.442695, %v757_v59  ;;  %v2941_v59 = vpack.c.bf16 %v1009_v57, %v1008_v55 }
 0xed0   :  { %2558 = vpow2.f32 %v2071_v61  ;;  %v1010_v61 = vld [vmem:[#allocation5 + $0x10] sm:$0xff] }
 0xed8   :  { %v2557_v60 = vpop.eup %2556 }
 0xed9   :  { %770 = vrot.lane.b32.xlu0 %v2557_v60, %s2699_s24 }
 0xeda   :  { %v2559_v6 = vpop.eup %2558 }
 0xedb   :  { %v761_v62 = vadd.f32 1.0, %v2559_v6  ;;  %v1011_v6 = vld [vmem:[#allocation5 + $0x18] sm:$0xff] }
 0xedd   :  { %2560 = vrcp.f32 %v761_v62  ;;  %v2944_v62 = vpack.c.bf16 %v1011_v6, %v1010_v61 }
 0xee7   :  { %v2561_v63 = vpop.eup %2560 }
 0xee8   :  { %v768_v4 = vmul.f32 %v2561_v63, %v766_v11 }
 0xf4b   :  { %v771_v0 = vpop.permute.xlu0 %770 }
 0xf4c   :  { %v773_v3 = vmul.f32 %v2561_v63, %v771_v0 }
 0xf4e   :  { %775 = vrot.lane.b32.xlu1 %v773_v3, %s2700_s3 }
 0xfc0   :  { %v776_v5 = vpop.permute.xlu1 %775 }
 0xfc1   :  { %v778_v7 = vadd.f32 %v776_v5, %v768_v4 }
 0xfc3   :  { %2562 = vtanh.f32 %v778_v7  ;;  %v873_v27 = vrot.slane %v778_v7, 6 }
 0xfcd   :  { %v2563_v8 = vpop.eup %2562 }
 0xfce   :  { %781 = vrot.lane.b32.xlu0 %v2563_v8, %s2699_s24  ;;  %v2076_v8 = vld [vmem:[%s3093_s6] ss:$0 sm:$0xff] }
0x1040   :  { %v782_v9 = vpop.permute.xlu0 %781 }
0x1041   :  { %v784_v10 = vmul.f32 %v2561_v63, %v782_v9 }
0x1043   :  { %v786_v12 = vrot.slane %v784_v10, 2  ;;  %v1005_v33 = vsel %vm999_vm3, %v2895_v54, %v784_v10  ;;  %v1013_v54 = vld [vmem:[%s3091_s4 + $0x8] sm:$0xff] }
0x1044   :  { %v2443_v56 = vpack.c.bf16 %v1013_v54, %v1012_v53 }
0x1045   :  { %787 = vrot.lane.b32.xlu1 %v786_v12, %s2700_s3 }
0x1046   :  { %2444 = vmatprep.subr.bf16.mxu1 %v2443_v56 }
0x10b7   :  { %v788_v13 = vpop.permute.xlu1 %787 }
0x10b8   :  { %2272 = vmatmul.mubr.msk.f32.vlgmr.msra.gmra.mrb[6].mxu1 %vm156_vm2, %v788_v13 }
0x10b9   :  { %2446 = vmatpush3.bf16.msra.mxu1 %v2443_v56 }
0x118b   :  { %v857_v15 = vpop.f32.mrb[6].mxu1 }
0x118c   :  { %v862_v17 = vrot.slane %v857_v15, 4  ;;  %v2273_v18 = vpop.f32.mrb[7].mxu1 }
0x118e   :  { %v864_v19 = vadd.f32 %v862_v17, %v2831_v14 }
0x1190   :  { %2564 = vtanh.f32 %v864_v19  ;;  %v2073_v21 = vmul.f32 -1.442695, %v864_v19 }
0x1192   :  { %2566 = vpow2.f32 %v2073_v21 }
0x119a   :  { %v2565_v20 = vpop.eup %2564 }
0x119b   :  { %877 = vrot.lane.b32.xlu0 %v2565_v20, %s2699_s24 }
0x119c   :  { %v2567_v22 = vpop.eup %2566 }
0x119d   :  { %v868_v23 = vadd.f32 1.0, %v2567_v22 }
0x119f   :  { %2568 = vrcp.f32 %v868_v23 }
0x11a9   :  { %v2569_v24 = vpop.eup %2568 }
0x11aa   :  { %v875_v28 = vmul.f32 %v2569_v24, %v873_v27 }
0x120d   :  { %v878_v25 = vpop.permute.xlu0 %877 }
0x120e   :  { %v880_v26 = vmul.f32 %v2569_v24, %v878_v25 }
0x1210   :  { %882 = vrot.lane.b32.xlu1 %v880_v26, %s2700_s3 }
0x1282   :  { %v883_v29 = vpop.permute.xlu1 %882 }
0x1283   :  { %v885_v30 = vadd.f32 %v883_v29, %v875_v28 }
0x1285   :  { %2570 = vtanh.f32 %v885_v30  ;;  %v980_v49 = vrot.slane %v885_v30, 6 }
0x128f   :  { %v2571_v31 = vpop.eup %2570 }
0x1290   :  { %888 = vrot.lane.b32.xlu0 %v2571_v31, %s2699_s24 }
0x1302   :  { %v889_v32 = vpop.permute.xlu0 %888 }
0x1303   :  { %v891_v16 = vmul.f32 %v2569_v24, %v889_v32 }
0x1305   :  { %v893_v34 = vrot.slane %v891_v16, 4  ;;  %v1006_v35 = vsel %vm1001_vm4, %v1005_v33, %v891_v16 }
0x1307   :  { %894 = vrot.lane.b32.xlu1 %v893_v34, %s2700_s3 }
0x1379   :  { %v895_v37 = vpop.permute.xlu1 %894 }
0x137a   :  { %2283 = vmatmul.mubr.msk.f32.vlgmr.msra.gmra.mrb[8].mxu0 %vm156_vm2, %v895_v37 }
0x137b   :  { %2304 = vmatprep.mubr.msk.f32.mxu0 %vm2697_vm0, %v2698_v2  ;;  %2453 = vmatpush3.bf16.msra.mxu0 %v2941_v59 }
0x137c   :  { %2454 = vmatprep.subr.bf16.mxu0 %v2696_v1 }
0x137f   :  { %2456 = vmatpush3.bf16.msra.mxu0 %v2944_v62 }
0x1380   :  { %2463 = vmatprep.subr.bf16.mxu0 %v2696_v1 }
0x1382   :  { %2305 = vmatmul.mubr.f32.vlgmr.msra.gmra.mrb[10].mxu0 %v2698_v2 }
0x1383   :  { %2465 = vmatpush3.bf16.msra.mxu0 %v2941_v59  ;;  %2326 = vmatprep.mubr.msk.f32.mxu0 %vm2697_vm0, %v2698_v2 }
0x1384   :  { %2466 = vmatprep.subr.bf16.mxu0 %v2696_v1 }
0x1387   :  { %2468 = vmatpush3.bf16.msra.mxu0 %v2944_v62 }
0x1388   :  { %2475 = vmatprep.subr.bf16.mxu0 %v2696_v1 }
0x144d   :  { %v964_v38 = vpop.f32.mrb[8].mxu0 }
0x144e   :  { %v969_v39 = vrot.slane %v964_v38, 2  ;;  %v2284_v40 = vpop.f32.mrb[9].mxu0 }
0x1450   :  { %v971_v41 = vadd.f32 %v969_v39, %v2831_v14 }
0x1452   :  { %2572 = vtanh.f32 %v971_v41  ;;  %v2075_v43 = vmul.f32 -1.442695, %v971_v41 }
0x1454   :  { %2574 = vpow2.f32 %v2075_v43 }
0x1455   :  { %v1174_v5 = vpop.f32.mrb[10].mxu0 }
0x1456   :  { %v2306_v7 = vpop.f32.mrb[11].mxu0 }
0x145c   :  { %v2573_v42 = vpop.eup %2572 }
0x145d   :  { %984 = vrot.lane.b32.xlu0 %v2573_v42, %s2699_s24 }
0x145e   :  { %v2575_v44 = vpop.eup %2574 }
0x145f   :  { %v975_v45 = vadd.f32 1.0, %v2575_v44 }
0x1461   :  { %2576 = vrcp.f32 %v975_v45 }
0x146b   :  { %v2577_v46 = vpop.eup %2576 }
0x146c   :  { %v982_v50 = vmul.f32 %v2577_v46, %v980_v49 }
0x14cf   :  { %v985_v47 = vpop.permute.xlu0 %984 }
0x14d0   :  { %v987_v48 = vmul.f32 %v2577_v46, %v985_v47 }
0x14d2   :  { %989 = vrot.lane.b32.xlu1 %v987_v48, %s2700_s3 }
0x14d6   :  { %1025 = vrot.lane.b32.xlu1 %v2882_v36, %s2700_s3  ;;  %v1014_v36 = vld [vmem:[%s3091_s4 + $0x10] sm:$0xff] }
0x14d7   :  { %v2447_v60 = vpack.c.bf16 %v1015_v58, %v1014_v36 }
0x14d9   :  { %2448 = vmatprep.subr.bf16.mxu1 %v2447_v60 }
0x14da   :  { %2450 = vmatpush3.bf16.msra.mxu1 %v2447_v60 }
0x14db   :  { %2457 = vmatprep.subr.bf16.mxu1 %v2696_v1 }
0x1544   :  { %v990_v14 = vpop.permute.xlu1 %989 }
0x1545   :  { %v992_v51 = vadd.f32 %v990_v14, %v982_v50 }
0x1547   :  { %2578 = vtanh.f32 %v992_v51 }
0x1548   :  { %v1026_v52 = vpop.permute.xlu1 %1025 }
0x1549   :  { %2293 = vmatprep.mubr.msk.f32.mxu1 %vm156_vm2, %v1026_v52 }
0x1551   :  { %v2579_v63 = vpop.eup %2578 }
0x1552   :  { %995 = vrot.lane.b32.xlu0 %v2579_v63, %s2699_s24 }
0x15c4   :  { %v996_v0 = vpop.permute.xlu0 %995 }
0x15c5   :  { %v998_v3 = vmul.f32 %v2577_v46, %v996_v0 }
0x15c7   :  { %v1007_v11 = vsel %vm1003_vm5, %v1006_v35, %v998_v3 }
0x15c8   :  { %1027 = vrot.lane.b32.xlu0 %v1007_v11, %s2700_s3 }
0x163a   :  { %v1028_v4 = vpop.permute.xlu0 %1027 }
0x163b   :  { %2294 = vmatmul.mubr.msk.f32.vlgmr.msra.gmra.mrb[8].mxu1 %vm156_vm2, %v1028_v4 }
0x163c   :  { %2459 = vmatpush3.bf16.msra.mxu1 %v2941_v59  ;;  %2315 = vmatprep.mubr.msk.f32.mxu1 %vm2697_vm0, %v2698_v2 }
0x163d   :  { %2460 = vmatprep.subr.bf16.mxu1 %v2696_v1 }
0x1640   :  { %2462 = vmatpush3.bf16.msra.mxu1 %v2944_v62 }
0x1641   :  { %2469 = vmatprep.subr.bf16.mxu1 %v2696_v1 }
0x170e   :  { %v2295_v9 = vpop.f32.mrb[8].mxu1 }
0x170f   :  { %v2970_v10 = vadd.f32 %v2295_v9, %v2076_v8  ;;  %v1099_v12 = vpop.f32.mrb[9].mxu1 }
0x1710   :  { %v2972_v13 = vadd.f32 %v2076_v8, %v1099_v12 }
0x1712   :  { %v1178_v15 = vadd.f32 %v1174_v5, %v2972_v13 }
0x1714   :  { %2580 = vtanh.f32 %v1178_v15  ;;  %v2079_v18 = vmul.f32 -1.442695, %v1178_v15 }
0x1716   :  { %2582 = vpow2.f32 %v2079_v18 }
0x171e   :  { %v2581_v17 = vpop.eup %2580 }
0x171f   :  { %1188 = vrot.lane.b32.xlu1 %v2581_v17, %s2699_s24 }
0x1720   :  { %v2583_v19 = vpop.eup %2582 }
0x1721   :  { %v1182_v20 = vadd.f32 1.0, %v2583_v19 }
0x1723   :  { %2584 = vrcp.f32 %v1182_v20 }
0x172d   :  { %v2585_v21 = vpop.eup %2584 }
0x172e   :  { %v1186_v24 = vmul.f32 0.0, %v2585_v21 }
0x1791   :  { %v1189_v22 = vpop.permute.xlu1 %1188 }
0x1792   :  { %v1191_v23 = vmul.f32 %v2585_v21, %v1189_v22 }
0x1794   :  { %1193 = vrot.lane.b32.xlu0 %v1191_v23, %s2700_s3 }
0x1806   :  { %v1194_v25 = vpop.permute.xlu0 %1193 }
0x1807   :  { %v1196_v26 = vadd.f32 %v1194_v25, %v1186_v24 }
0x1809   :  { %2586 = vtanh.f32 %v1196_v26  ;;  %v1290_v42 = vrot.slane %v1196_v26, 6 }
0x1813   :  { %v2587_v27 = vpop.eup %2586 }
0x1814   :  { %1199 = vrot.lane.b32.xlu1 %v2587_v27, %s2699_s24 }
0x1886   :  { %v1200_v28 = vpop.permute.xlu1 %1199 }
0x1887   :  { %v2978_v29 = vmul.f32 %v2585_v21, %v1200_v28 }
0x1889   :  { %1204 = vrot.lane.b32.xlu0 %v2978_v29, %s2700_s3 }
0x18fb   :  { %v1205_v30 = vpop.permute.xlu0 %1204 }
0x18fc   :  { %2316 = vmatmul.mubr.msk.f32.vlgmr.msra.gmra.mrb[10].mxu1 %vm156_vm2, %v1205_v30 }
0x18fd   :  { %2471 = vmatpush3.bf16.msra.mxu1 %v2941_v59  ;;  %2337 = vmatprep.mubr.msk.f32.mxu1 %vm2697_vm0, %v2698_v2 }
0x18fe   :  { %2472 = vmatprep.subr.bf16.mxu1 %v2696_v1 }
0x1901   :  { %2474 = vmatpush3.bf16.msra.mxu1 %v2944_v62 }
0x1902   :  { %2481 = vmatprep.subr.bf16.mxu1 %v2696_v1 }
0x19cf   :  { %v1274_v31 = vpop.f32.mrb[10].mxu1 }
0x19d0   :  { %v1279_v32 = vrot.slane %v1274_v31, 6  ;;  %v2317_v16 = vpop.f32.mrb[11].mxu1 }
0x19d2   :  { %v1281_v33 = vadd.f32 %v1279_v32, %v2972_v13 }
0x19d4   :  { %2588 = vtanh.f32 %v1281_v33  ;;  %v2081_v35 = vmul.f32 -1.442695, %v1281_v33 }
0x19d6   :  { %2590 = vpow2.f32 %v2081_v35 }
0x19de   :  { %v2589_v34 = vpop.eup %2588 }
0x19df   :  { %1294 = vrot.lane.b32.xlu1 %v2589_v34, %s2699_s24 }
0x19e0   :  { %v2591_v37 = vpop.eup %2590 }
0x19e1   :  { %v1285_v38 = vadd.f32 1.0, %v2591_v37 }
0x19e3   :  { %2592 = vrcp.f32 %v1285_v38 }
0x19ed   :  { %v2593_v39 = vpop.eup %2592 }
0x19ee   :  { %v1292_v43 = vmul.f32 %v2593_v39, %v1290_v42 }
0x1a51   :  { %v1295_v40 = vpop.permute.xlu1 %1294 }
0x1a52   :  { %v1297_v41 = vmul.f32 %v2593_v39, %v1295_v40 }
0x1a54   :  { %1299 = vrot.lane.b32.xlu0 %v1297_v41, %s2700_s3 }
0x1ac6   :  { %v1300_v44 = vpop.permute.xlu0 %1299 }
0x1ac7   :  { %v1302_v45 = vadd.f32 %v1300_v44, %v1292_v43 }
0x1ac9   :  { %2594 = vtanh.f32 %v1302_v45  ;;  %v1397_v61 = vrot.slane %v1302_v45, 6 }
0x1ad3   :  { %v2595_v46 = vpop.eup %2594 }
0x1ad4   :  { %1305 = vrot.lane.b32.xlu1 %v2595_v46, %s2699_s24 }
0x1b46   :  { %v1306_v47 = vpop.permute.xlu1 %1305 }
0x1b47   :  { %v1308_v48 = vmul.f32 %v2593_v39, %v1306_v47 }
0x1b49   :  { %v1310_v49 = vrot.slane %v1308_v48, 2  ;;  %v1947_v5 = vsel %vm999_vm3, %v2978_v29, %v1308_v48 }
0x1b4b   :  { %1311 = vrot.lane.b32.xlu0 %v1310_v49, %s2700_s3 }
0x1bbd   :  { %v1312_v50 = vpop.permute.xlu0 %1311 }
0x1bbe   :  { %2327 = vmatmul.mubr.msk.f32.vlgmr.msra.gmra.mrb[12].mxu0 %vm156_vm2, %v1312_v50 }
0x1bbf   :  { %2477 = vmatpush3.bf16.msra.mxu0 %v2941_v59  ;;  %2348 = vmatprep.mubr.msk.f32.mxu0 %vm2697_vm0, %v2698_v2 }
0x1bc0   :  { %2478 = vmatprep.subr.bf16.mxu0 %v2696_v1 }
0x1bc3   :  { %2480 = vmatpush3.bf16.msra.mxu0 %v2944_v62 }
0x1bc4   :  { %2487 = vmatprep.subr.bf16.mxu0 %v2696_v1 }
0x1c91   :  { %v1381_v14 = vpop.f32.mrb[12].mxu0 }
0x1c92   :  { %v1386_v51 = vrot.slane %v1381_v14, 4  ;;  %v2328_v52 = vpop.f32.mrb[13].mxu0 }
0x1c94   :  { %v1388_v53 = vadd.f32 %v1386_v51, %v2972_v13 }
0x1c96   :  { %2596 = vtanh.f32 %v1388_v53  ;;  %v2083_v55 = vmul.f32 -1.442695, %v1388_v53 }
0x1c98   :  { %2598 = vpow2.f32 %v2083_v55 }
0x1ca0   :  { %v2597_v54 = vpop.eup %2596 }
0x1ca1   :  { %1401 = vrot.lane.b32.xlu1 %v2597_v54, %s2699_s24 }
0x1ca2   :  { %v2599_v56 = vpop.eup %2598 }
0x1ca3   :  { %v1392_v57 = vadd.f32 1.0, %v2599_v56 }
0x1ca5   :  { %2600 = vrcp.f32 %v1392_v57 }
0x1caf   :  { %v2601_v36 = vpop.eup %2600 }
0x1cb0   :  { %v1399_v6 = vmul.f32 %v2601_v36, %v1397_v61 }
0x1d13   :  { %v1402_v58 = vpop.permute.xlu1 %1401 }
0x1d14   :  { %v1404_v60 = vmul.f32 %v2601_v36, %v1402_v58 }
0x1d16   :  { %1406 = vrot.lane.b32.xlu0 %v1404_v60, %s2700_s3 }
0x1d88   :  { %v1407_v63 = vpop.permute.xlu0 %1406 }
0x1d89   :  { %v1409_v0 = vadd.f32 %v1407_v63, %v1399_v6 }
0x1d8b   :  { %2602 = vtanh.f32 %v1409_v0  ;;  %v1504_v26 = vrot.slane %v1409_v0, 6 }
0x1d95   :  { %v2603_v3 = vpop.eup %2602 }
0x1d96   :  { %1412 = vrot.lane.b32.xlu1 %v2603_v3, %s2699_s24 }
0x1e08   :  { %v1413_v11 = vpop.permute.xlu1 %1412 }
0x1e09   :  { %v1415_v4 = vmul.f32 %v2601_v36, %v1413_v11 }
0x1e0b   :  { %v1417_v7 = vrot.slane %v1415_v4, 4  ;;  %v1948_v8 = vsel %vm1001_vm4, %v1947_v5, %v1415_v4 }
0x1e0d   :  { %1418 = vrot.lane.b32.xlu0 %v1417_v7, %s2700_s3 }
0x1e7f   :  { %v1419_v9 = vpop.permute.xlu0 %1418 }
0x1e80   :  { %2338 = vmatmul.mubr.msk.f32.vlgmr.msra.gmra.mrb[12].mxu1 %vm156_vm2, %v1419_v9 }
0x1e81   :  { %2483 = vmatpush3.bf16.msra.mxu1 %v2941_v59  ;;  %2359 = vmatprep.mubr.msk.f32.mxu1 %vm2697_vm0, %v2698_v2 }
0x1e82   :  { %2484 = vmatprep.subr.bf16.mxu1 %v2696_v1 }
0x1e85   :  { %2486 = vmatpush3.bf16.msra.mxu1 %v2944_v62 }
0x1e86   :  { %2493 = vmatprep.subr.bf16.mxu1 %v2696_v1 }
0x1f53   :  { %v1488_v12 = vpop.f32.mrb[12].mxu1 }
0x1f54   :  { %v1493_v15 = vrot.slane %v1488_v12, 2  ;;  %v2339_v17 = vpop.f32.mrb[13].mxu1 }
0x1f56   :  { %v1495_v18 = vadd.f32 %v1493_v15, %v2972_v13 }
0x1f58   :  { %2604 = vtanh.f32 %v1495_v18  ;;  %v2085_v20 = vmul.f32 -1.442695, %v1495_v18 }
0x1f5a   :  { %2606 = vpow2.f32 %v2085_v20 }
0x1f62   :  { %v2605_v19 = vpop.eup %2604 }
0x1f63   :  { %1508 = vrot.lane.b32.xlu1 %v2605_v19, %s2699_s24 }
0x1f64   :  { %v2607_v21 = vpop.eup %2606 }
0x1f65   :  { %v1499_v22 = vadd.f32 1.0, %v2607_v21 }
0x1f67   :  { %2608 = vrcp.f32 %v1499_v22 }
0x1f71   :  { %v2609_v23 = vpop.eup %2608 }
0x1f72   :  { %v1506_v27 = vmul.f32 %v2609_v23, %v1504_v26 }
0x1fd5   :  { %v1509_v24 = vpop.permute.xlu1 %1508 }
0x1fd6   :  { %v1511_v25 = vmul.f32 %v2609_v23, %v1509_v24 }
0x1fd8   :  { %1513 = vrot.lane.b32.xlu0 %v1511_v25, %s2700_s3 }
0x204a   :  { %v1514_v28 = vpop.permute.xlu0 %1513 }
0x204b   :  { %v1516_v29 = vadd.f32 %v1514_v28, %v1506_v27 }
0x204d   :  { %2610 = vtanh.f32 %v1516_v29  ;;  %v1608_v45 = vrot.slane %v1516_v29, 6 }
0x2057   :  { %v2611_v13 = vpop.eup %2610 }
0x2058   :  { %1519 = vrot.lane.b32.xlu1 %v2611_v13, %s2699_s24 }
0x20ca   :  { %v1520_v30 = vpop.permute.xlu1 %1519 }
0x20cb   :  { %v1522_v31 = vmul.f32 %v2609_v23, %v1520_v30 }
0x20cd   :  { %v1524_v32 = vrot.slane %v1522_v31, 6  ;;  %v3021_v16 = vsel %vm1003_vm5, %v1948_v8, %v1522_v31 }
0x20cf   :  { %1525 = vrot.lane.b32.xlu0 %v1524_v32, %s2700_s3 }
0x2141   :  { %v1526_v33 = vpop.permute.xlu0 %1525 }
0x2142   :  { %2349 = vmatmul.mubr.msk.f32.vlgmr.msra.gmra.mrb[14].mxu0 %vm156_vm2, %v1526_v33 }
0x2143   :  { %2489 = vmatpush3.bf16.msra.mxu0 %v2941_v59  ;;  %2370 = vmatprep.mubr.msk.f32.mxu0 %vm2697_vm0, %v2698_v2 }
0x2144   :  { %2490 = vmatprep.subr.bf16.mxu0 %v2696_v1 }
0x2147   :  { %2492 = vmatpush3.bf16.msra.mxu0 %v2944_v62 }
0x2215   :  { %v1595_v34 = vpop.f32.mrb[14].mxu0 }
0x2216   :  { %v1599_v35 = vadd.f32 %v1595_v34, %v2970_v10  ;;  %v2350_v37 = vpop.f32.mrb[15].mxu0 }
0x2218   :  { %2612 = vtanh.f32 %v1599_v35  ;;  %v2087_v39 = vmul.f32 -1.442695, %v1599_v35 }
0x221a   :  { %2614 = vpow2.f32 %v2087_v39 }
0x2222   :  { %v2613_v38 = vpop.eup %2612 }
0x2223   :  { %1612 = vrot.lane.b32.xlu1 %v2613_v38, %s2699_s24 }
0x2224   :  { %v2615_v40 = vpop.eup %2614 }
0x2225   :  { %v1603_v41 = vadd.f32 1.0, %v2615_v40 }
0x2227   :  { %2616 = vrcp.f32 %v1603_v41 }
0x2231   :  { %v2617_v42 = vpop.eup %2616 }
0x2232   :  { %v1610_v46 = vmul.f32 %v2617_v42, %v1608_v45 }
0x2295   :  { %v1613_v43 = vpop.permute.xlu1 %1612 }
0x2296   :  { %v1615_v44 = vmul.f32 %v2617_v42, %v1613_v43 }
0x2298   :  { %1617 = vrot.lane.b32.xlu0 %v1615_v44, %s2700_s3 }
0x230a   :  { %v1618_v47 = vpop.permute.xlu0 %1617 }
0x230b   :  { %v1620_v48 = vadd.f32 %v1618_v47, %v1610_v46 }
0x230d   :  { %2618 = vtanh.f32 %v1620_v48 }
0x2317   :  { %v2619_v49 = vpop.eup %2618 }
0x2318   :  { %1623 = vrot.lane.b32.xlu1 %v2619_v49, %s2699_s24  ;;  %v1954_v49 = vld [vmem:[%s3094_s7 + $0x8] sm:$0xff] }
0x238a   :  { %v1624_v50 = vpop.permute.xlu1 %1623 }
0x238b   :  { %v3034_v14 = vmul.f32 %v2617_v42, %v1624_v50  ;;  %v1955_v50 = vld [vmem:[%s3094_s7 + $0x10] sm:$0xff] }
0x238d   :  { %1628 = vrot.lane.b32.xlu0 %v3034_v14, %s2700_s3 }
0x23ff   :  { %v1629_v51 = vpop.permute.xlu0 %1628 }
0x2400   :  { %2360 = vmatmul.mubr.msk.f32.vlgmr.msra.gmra.mrb[14].mxu1 %vm156_vm2, %v1629_v51 }
0x2401   :  { %2495 = vmatpush3.bf16.msra.mxu1 %v2941_v59  ;;  %2381 = vmatprep.mubr.msk.f32.mxu1 %vm2697_vm0, %v2698_v2 }
0x2402   :  { %2496 = vmatprep.subr.bf16.mxu1 %v2696_v1  ;;  %v1714_v1 = vrot.slane %v1620_v48, 6  ;;  %v1953_v48 = vld [vmem:[%s3094_s7] sm:$0xff] }
0x2405   :  { %2498 = vmatpush3.bf16.msra.mxu1 %v2944_v62 }
0x24d3   :  { %v1698_v52 = vpop.f32.mrb[14].mxu1 }
0x24d4   :  { %v1703_v53 = vrot.slane %v1698_v52, 6  ;;  %v2361_v54 = vpop.f32.mrb[15].mxu1 }
0x24d6   :  { %v1705_v55 = vadd.f32 %v1703_v53, %v2970_v10 }
0x24d8   :  { %2620 = vtanh.f32 %v1705_v55  ;;  %v2089_v57 = vmul.f32 -1.442695, %v1705_v55 }
0x24da   :  { %2622 = vpow2.f32 %v2089_v57  ;;  %v2094_v57 = vld [vmem:[#allocation2] ss:$0 sm:$0xff] }
0x24e2   :  { %v2621_v56 = vpop.eup %2620 }
0x24e3   :  { %1718 = vrot.lane.b32.xlu1 %v2621_v56, %s2699_s24 }
0x24e4   :  { %v2623_v36 = vpop.eup %2622 }
0x24e5   :  { %v1709_v59 = vadd.f32 1.0, %v2623_v36 }
0x24e7   :  { %2624 = vrcp.f32 %v1709_v59 }
0x24f1   :  { %v2625_v58 = vpop.eup %2624 }
0x24f2   :  { %v1716_v62 = vmul.f32 %v2625_v58, %v1714_v1 }
0x2555   :  { %v1719_v2 = vpop.permute.xlu1 %1718 }
0x2556   :  { %v1721_v60 = vmul.f32 %v2625_v58, %v1719_v2 }
0x2558   :  { %1723 = vrot.lane.b32.xlu0 %v1721_v60, %s2700_s3 }
0x25ca   :  { %v1724_v61 = vpop.permute.xlu0 %1723 }
0x25cb   :  { %v1726_v6 = vadd.f32 %v1724_v61, %v1716_v62 }
0x25cd   :  { %2626 = vtanh.f32 %v1726_v6  ;;  %v1821_v22 = vrot.slane %v1726_v6, 6 }
0x25d7   :  { %v2627_v63 = vpop.eup %2626 }
0x25d8   :  { %1729 = vrot.lane.b32.xlu1 %v2627_v63, %s2699_s24 }
0x264a   :  { %v1730_v0 = vpop.permute.xlu1 %1729 }
0x264b   :  { %v1732_v3 = vmul.f32 %v2625_v58, %v1730_v0 }
0x264d   :  { %v1734_v11 = vrot.slane %v1732_v3, 2  ;;  %v1950_v29 = vsel %vm999_vm3, %v3034_v14, %v1732_v3  ;;  %v1956_v14 = vld [vmem:[%s3094_s7 + $0x18] sm:$0xff] }
0x264e   :  { %v2503_v51 = vpack.c.bf16 %v1956_v14, %v1955_v50 }
0x264f   :  { %1735 = vrot.lane.b32.xlu0 %v1734_v11, %s2700_s3 }
0x26c1   :  { %v1736_v4 = vpop.permute.xlu0 %1735 }
0x26c2   :  { %2371 = vmatmul.mubr.msk.f32.vlgmr.msra.gmra.mrb[16].mxu0 %vm156_vm2, %v1736_v4 }
0x2795   :  { %v1805_v5 = vpop.f32.mrb[16].mxu0 }
0x2796   :  { %v1810_v7 = vrot.slane %v1805_v5, 4  ;;  %v2372_v8 = vpop.f32.mrb[17].mxu0 }
0x2798   :  { %v1812_v9 = vadd.f32 %v1810_v7, %v2970_v10 }
0x279a   :  { %2628 = vtanh.f32 %v1812_v9  ;;  %v2091_v15 = vmul.f32 -1.442695, %v1812_v9 }
0x279c   :  { %2630 = vpow2.f32 %v2091_v15 }
0x27a4   :  { %v2629_v12 = vpop.eup %2628 }
0x27a5   :  { %1825 = vrot.lane.b32.xlu1 %v2629_v12, %s2699_s24 }
0x27a6   :  { %v2631_v17 = vpop.eup %2630 }
0x27a7   :  { %v1816_v18 = vadd.f32 1.0, %v2631_v17 }
0x27a9   :  { %2632 = vrcp.f32 %v1816_v18 }
0x27b3   :  { %v2633_v19 = vpop.eup %2632 }
0x27b4   :  { %v1823_v23 = vmul.f32 %v2633_v19, %v1821_v22 }
0x2817   :  { %v1826_v20 = vpop.permute.xlu1 %1825 }
0x2818   :  { %v1828_v21 = vmul.f32 %v2633_v19, %v1826_v20 }
0x281a   :  { %1830 = vrot.lane.b32.xlu0 %v1828_v21, %s2700_s3 }
0x288c   :  { %v1831_v24 = vpop.permute.xlu0 %1830 }
0x288d   :  { %v1833_v25 = vadd.f32 %v1831_v24, %v1823_v23 }
0x288f   :  { %2634 = vtanh.f32 %v1833_v25  ;;  %v1928_v44 = vrot.slane %v1833_v25, 6 }
0x2899   :  { %v2635_v26 = vpop.eup %2634 }
0x289a   :  { %1836 = vrot.lane.b32.xlu1 %v2635_v26, %s2699_s24 }
0x290c   :  { %v1837_v27 = vpop.permute.xlu1 %1836 }
0x290d   :  { %v1839_v28 = vmul.f32 %v2633_v19, %v1837_v27 }
0x290f   :  { %v1841_v13 = vrot.slane %v1839_v28, 4  ;;  %v1951_v30 = vsel %vm1001_vm4, %v1950_v29, %v1839_v28 }
0x2911   :  { %1842 = vrot.lane.b32.xlu0 %v1841_v13, %s2700_s3 }
0x2983   :  { %v1843_v31 = vpop.permute.xlu0 %1842 }
0x2984   :  { %2382 = vmatmul.mubr.msk.f32.vlgmr.msra.gmra.mrb[16].mxu1 %vm156_vm2, %v1843_v31 }
0x2a57   :  { %v1912_v32 = vpop.f32.mrb[16].mxu1 }
0x2a58   :  { %v1917_v33 = vrot.slane %v1912_v32, 2  ;;  %v2383_v34 = vpop.f32.mrb[17].mxu1 }
0x2a5a   :  { %v1919_v35 = vadd.f32 %v1917_v33, %v2970_v10 }
0x2a5c   :  { %2636 = vtanh.f32 %v1919_v35  ;;  %v2093_v38 = vmul.f32 -1.442695, %v1919_v35 }
0x2a5e   :  { %2638 = vpow2.f32 %v2093_v38 }
0x2a66   :  { %v2637_v37 = vpop.eup %2636 }
0x2a67   :  { %1932 = vrot.lane.b32.xlu1 %v2637_v37, %s2699_s24 }
0x2a68   :  { %v2639_v39 = vpop.eup %2638 }
0x2a69   :  { %v1923_v40 = vadd.f32 1.0, %v2639_v39 }
0x2a6b   :  { %2640 = vrcp.f32 %v1923_v40 }
0x2a75   :  { %v2641_v41 = vpop.eup %2640 }
0x2a76   :  { %v1930_v45 = vmul.f32 %v2641_v41, %v1928_v44 }
0x2ad9   :  { %v1933_v42 = vpop.permute.xlu1 %1932 }
0x2ada   :  { %v1935_v43 = vmul.f32 %v2641_v41, %v1933_v42 }
0x2adc   :  { %1937 = vrot.lane.b32.xlu0 %v1935_v43, %s2700_s3 }
0x2ae0   :  { %1966 = vrot.lane.b32.xlu0 %v3021_v16, %s2700_s3  ;;  %v2499_v16 = vpack.c.bf16 %v1954_v49, %v1953_v48 }
0x2ae2   :  { %2500 = vmatprep.subr.bf16.mxu0 %v2499_v16 }
0x2ae3   :  { %2502 = vmatpush3.bf16.msra.mxu0 %v2499_v16 }
0x2ae4   :  { %2504 = vmatprep.subr.bf16.mxu0 %v2503_v51 }
0x2ae7   :  { %2506 = vmatpush3.bf16.msra.mxu0 %v2503_v51 }
0x2b4e   :  { %v1938_v10 = vpop.permute.xlu0 %1937 }
0x2b4f   :  { %v1940_v46 = vadd.f32 %v1938_v10, %v1930_v45 }
0x2b51   :  { %2642 = vtanh.f32 %v1940_v46 }
0x2b52   :  { %v1967_v47 = vpop.permute.xlu0 %1966 }
0x2b53   :  { %2392 = vmatprep.mubr.msk.f32.mxu0 %vm156_vm2, %v1967_v47 }
0x2b5b   :  { %v2643_v52 = vpop.eup %2642 }
0x2b5c   :  { %1943 = vrot.lane.b32.xlu1 %v2643_v52, %s2699_s24 }
0x2bce   :  { %v1944_v53 = vpop.permute.xlu1 %1943 }
0x2bcf   :  { %v1946_v54 = vmul.f32 %v2641_v41, %v1944_v53 }
0x2bd1   :  { %v1952_v55 = vsel %vm1003_vm5, %v1951_v30, %v1946_v54 }
0x2bd2   :  { %1968 = vrot.lane.b32.xlu1 %v1952_v55, %s2700_s3 }
0x2c44   :  { %v1969_v56 = vpop.permute.xlu1 %1968 }
0x2c45   :  { %2393 = vmatmul.mubr.msk.f32.vlgmr.msra.gmra.mrb[18].mxu0 %vm156_vm2, %v1969_v56 }
0x2d18   :  { %v2394_v36 = vpop.f32.mrb[18].mxu0 }
0x2d19   :  { %v2046_v59 = vadd.f32 %v2394_v36, %v2094_v57  ;;  %v2040_v58 = vpop.f32.mrb[19].mxu0 }
0x2d1a   :  { %v2041_v2 = vadd.f32 %v2094_v57, %v2040_v58 }
0x2d1b   :  { %2051 = vst.msk [vmem:[%s3096_s9 + $0x8] sm:$0xff] %vm2049_vm6, %v2046_v59 }
0x2d1c   :  { %2050 = vst.msk [vmem:[%s3096_s9] sm:$0xff] %vm2049_vm6, %v2041_v2 }
0x2d1d   :  { %2056 = vsyncpa [#allocation4], 1 }
0x2d1e   :  { %2057 = vsyncpa [#allocation6], 1 }

</bundles_post_ra>
